<compile_context>
chip_gen: v7x
topology: tpu7x:2x2x1
jax: 0.10.0
libtpu: 0.0.40
codegen_flags: <defaults>
</compile_context>

<pallas_src>
import functools

import jax
import jax.numpy as jnp
from jax import lax
from jax.experimental import pallas as pl
from jax.experimental.pallas import tpu as pltpu


def _lstm_kernel(x_ref, wih_ref, whh_ref, b_ref, wout_ref, bout_ref,
                 out_ref, gx_sc, hall_sc, *, seq_len):
    """One batch shard. x_ref is (T*Bb, n_in), time-major (row = t*Bb + b)."""
    T = seq_len
    H = whh_ref.shape[0]
    Bb = x_ref.shape[0] // T
    aligned = (Bb % 8 == 0)

    # (1) Input projection for every timestep at once (off the serial path):
    #     gx[t*Bb + b, :] = x_t[b] @ W_ih^T + (b_ih + b_hh)
    #     (g-gate columns of W_ih/W_hh/bias are pre-scaled by 2 in the wrapper)
    gx_sc[...] = (jnp.dot(x_ref[...], wih_ref[...],
                          preferred_element_type=jnp.float32)
                  + b_ref[...])

    # (2) Serial recurrence: h/c live in registers (loop carry), one MXU
    #     matmul + gate math per step.
    def step(t, carry):
        h, c = carry
        row = t * Bb
        if aligned:
            row = pl.multiple_of(row, 8)          # sublane-aligned dyn slice
        gates = gx_sc[pl.ds(row, Bb), :] + jnp.dot(
            h, whh_ref[...], preferred_element_type=jnp.float32)
        # One full-width sigmoid over all 4H gate columns (i, f, g, o);
        # tanh(g) is recovered as 2*sigmoid(2g) - 1 via the wrapper pre-scale.
        sig = jax.nn.sigmoid(gates)
        i_g = sig[:, 0 * H:1 * H]
        f_g = sig[:, 1 * H:2 * H]
        g_g = 2.0 * sig[:, 2 * H:3 * H] - 1.0
        o_g = sig[:, 3 * H:4 * H]
        c_new = f_g * c + i_g * g_g
        h_new = o_g * jnp.tanh(c_new)
        hall_sc[pl.ds(row, Bb), :] = h_new        # stash h_t (off crit. path)
        return (h_new, c_new)

    zeros = jnp.zeros((Bb, H), jnp.float32)       # zero initial state
    lax.fori_loop(0, T, step, (zeros, zeros), unroll=min(8, T))

    # (3) output_fc once over the whole shard, emitted transposed so the
    #     store / writeback DMA are lane-dense over T*Bb:
    #     out[o, r] = sum_h W_out[o, h] * hall[r, h] + b_out[o]
    out_t = lax.dot_general(
        wout_ref[...], hall_sc[...],
        dimension_numbers=(((1,), (1,)), ((), ())),
        preferred_element_type=jnp.float32)                 # (n_out, T*Bb)
    out_ref[...] = (out_t + bout_ref[...]).astype(out_ref.dtype)


def _num_pallas_tensorcores():
    """2 grid-parallel TensorCores only on v7x; v5e/v6e expose a single TC."""
    try:
        kind = jax.devices()[0].device_kind.lower()
    except Exception:
        return 1
    return 2 if "v7" in kind else 1


def _pick_batch_block(batch):
    """Only shard the batch when the chip really has 2 TCs (v7x); on single-TC
    chips a 'parallel' grid axis is just a serial loop and halving Bb doubles
    the serial step count for zero parallelism."""
    if _num_pallas_tensorcores() >= 2 and batch % 16 == 0:
        return batch // 2
    return batch


def identification_net_forward(inputs, params, *, block_b=None):
    """inputs: (B, T, n_inputs) float32.  Returns (B, T, n_outputs) float32."""
    w_ih, w_hh, b_ih, b_hh, w_out, b_out = (
        params["w_ih"], params["w_hh"], params["b_ih"], params["b_hh"],
        params["w_out"], params["b_out"])

    B, T, n_in = inputs.shape
    H = w_hh.shape[1]
    n_out = w_out.shape[0]

    Bb = _pick_batch_block(B) if block_b is None else block_b
    assert B % Bb == 0, "block_b must divide the batch size"
    nb = B // Bb

    # Layout prep (cheap XLA ops, outside the serial recurrence):
    #   (B, T, n_in) -> (nb, T*Bb, n_in), time-major within each batch block.
    x_blk = jnp.transpose(inputs.reshape(nb, Bb, T, n_in), (0, 2, 1, 3))
    x_blk = x_blk.reshape(nb, T * Bb, n_in)

    # Pre-transpose weights so the kernel does plain (rows, K) @ (K, N)
    # matmuls, and fold the x2 g-gate pre-scale (for the tanh-via-sigmoid
    # trick) into the weights/bias once.
    gate_scale = jnp.concatenate(
        [jnp.ones((2 * H,), jnp.float32),
         jnp.full((H,), 2.0, jnp.float32),
         jnp.ones((H,), jnp.float32)])                       # (4H,)
    wih_t = jnp.transpose(w_ih) * gate_scale[None, :]        # (n_in, 4H)
    whh_t = jnp.transpose(w_hh) * gate_scale[None, :]        # (H,    4H)
    bias = ((b_ih + b_hh) * gate_scale).reshape(1, -1)       # (1,    4H)
    bout = b_out.reshape(-1, 1)                              # (n_out, 1)

    kernel = functools.partial(_lstm_kernel, seq_len=T)

    out_blk = pl.pallas_call(
        kernel,
        out_shape=jax.ShapeDtypeStruct((nb, n_out, T * Bb), jnp.float32),
        grid_spec=pltpu.PrefetchScalarGridSpec(
            num_scalar_prefetch=0,
            grid=(nb,),                                        # batch shards
            in_specs=[
                pl.BlockSpec((None, T * Bb, n_in), lambda b: (b, 0, 0)),  # x
                pl.BlockSpec((n_in, 4 * H), lambda b: (0, 0)),            # W_ih^T
                pl.BlockSpec((H, 4 * H), lambda b: (0, 0)),               # W_hh^T
                pl.BlockSpec((1, 4 * H), lambda b: (0, 0)),               # bias
                pl.BlockSpec((n_out, H), lambda b: (0, 0)),               # W_out
                pl.BlockSpec((n_out, 1), lambda b: (0, 0)),               # b_out
            ],
            out_specs=pl.BlockSpec((None, n_out, T * Bb), lambda b: (b, 0, 0)),
            scratch_shapes=[
                pltpu.VMEM((T * Bb, 4 * H), jnp.float32),   # precomputed x proj
                pltpu.VMEM((T * Bb, H), jnp.float32),       # all h_t (lane-dense)
            ],
        ),
        compiler_params=pltpu.CompilerParams(
            dimension_semantics=("parallel",)),   # batch shards are independent
    )(x_blk, wih_t, whh_t, bias, w_out, bout)

    # (nb, n_out, T*Bb) -> (B, T, n_out)
    out = out_blk.reshape(nb, n_out, T, Bb)
    out = jnp.transpose(out, (0, 3, 2, 1)).reshape(B, T, n_out)
    return out


def _init_params(key, n_inputs, n_outputs, n_states):
    ks = jax.random.split(key, 6)
    s = 0.1
    return {
        # PyTorch nn.LSTM parameter shapes (gate order i, f, g, o):
        "w_ih": s * jax.random.normal(ks[0], (4 * n_states, n_inputs), jnp.float32),
        "w_hh": s * jax.random.normal(ks[1], (4 * n_states, n_states), jnp.float32),
        "b_ih": s * jax.random.normal(ks[2], (4 * n_states,), jnp.float32),
        "b_hh": s * jax.random.normal(ks[3], (4 * n_states,), jnp.float32),
        # output_fc
        "w_out": s * jax.random.normal(ks[4], (n_outputs, n_states), jnp.float32),
        "b_out": s * jax.random.normal(ks[5], (n_outputs,), jnp.float32),
        # NOTE: input_fc / state_fc exist in __init__ but are unused by forward().
    }


def _reference_forward(inputs, params):
    """Pure-JAX LSTM reference matching torch.nn.LSTM semantics."""
    w_ih, w_hh = params["w_ih"], params["w_hh"]
    b = params["b_ih"] + params["b_hh"]
    H = w_hh.shape[1]
    B = inputs.shape[0]

    def step(carry, x_t):
        h, c = carry
        gates = x_t @ w_ih.T + h @ w_hh.T + b
        i = jax.nn.sigmoid(gates[:, 0 * H:1 * H])
        f = jax.nn.sigmoid(gates[:, 1 * H:2 * H])
        g = jnp.tanh(gates[:, 2 * H:3 * H])
        o = jax.nn.sigmoid(gates[:, 3 * H:4 * H])
        c = f * c + i * g
        h = o * jnp.tanh(c)
        return (h, c), h

    h0 = jnp.zeros((B, H), jnp.float32)
    (_, _), hs = jax.lax.scan(step, (h0, h0), jnp.transpose(inputs, (1, 0, 2)))
    outs = hs @ params["w_out"].T + params["b_out"]
    return jnp.transpose(outs, (1, 0, 2))


if __name__ == "__main__":
    n_inputs, n_outputs, n_states = 8, 4, 32
    batch, seq = 16, 8        # T*Bb = 128 rows -> lane-dense transposed output

    key = jax.random.PRNGKey(0)
    pkey, xkey = jax.random.split(key)
    params = _init_params(pkey, n_inputs, n_outputs, n_states)
    inputs = jax.random.normal(xkey, (batch, seq, n_inputs), jnp.float32)

    out = identification_net_forward(inputs, params)
    out = jax.block_until_ready(out)

    ref = _reference_forward(inputs, params)
    assert out.shape == (batch, seq, n_outputs)
    assert jnp.allclose(out, ref, atol=1e-5, rtol=1e-5), float(
        jnp.max(jnp.abs(out - ref)))

    print("KERNEL_OK")
</pallas_src>

<mosaic_0001>
module attributes {stable_mosaic.version = 11 : i64} {
  func.func @_lstm_kernel(%arg0: i32, %arg1: memref<1x128x8xf32, #tpu.memory_space<vmem>>, %arg2: memref<8x128xf32, #tpu.memory_space<vmem>>, %arg3: memref<32x128xf32, #tpu.memory_space<vmem>>, %arg4: memref<1x128xf32, #tpu.memory_space<vmem>>, %arg5: memref<4x32xf32, #tpu.memory_space<vmem>>, %arg6: memref<4x1xf32, #tpu.memory_space<vmem>>, %arg7: memref<1x4x128xf32, #tpu.memory_space<vmem>>, %arg8: memref<128x128xf32, #tpu.memory_space<vmem>>, %arg9: memref<128x32xf32, #tpu.memory_space<vmem>>) attributes {dimension_semantics = [#tpu.dimension_semantics<parallel>], iteration_bounds = array<i64: 1>, scalar_prefetch = 0 : i64, scratch_operands = 2 : i64, tpu.core_type = #tpu.core_type<tc>, window_params = [{transform_indices = @transform_0, window_bounds = array<i64: 1, 128, 8>}, {pipeline_mode = #tpu.pipeline_mode<synchronous>, transform_indices = @transform_1, window_bounds = array<i64: 8, 128>}, {pipeline_mode = #tpu.pipeline_mode<synchronous>, transform_indices = @transform_2, window_bounds = array<i64: 32, 128>}, {pipeline_mode = #tpu.pipeline_mode<synchronous>, transform_indices = @transform_3, window_bounds = array<i64: 1, 128>}, {pipeline_mode = #tpu.pipeline_mode<synchronous>, transform_indices = @transform_4, window_bounds = array<i64: 4, 32>}, {pipeline_mode = #tpu.pipeline_mode<synchronous>, transform_indices = @transform_5, window_bounds = array<i64: 4, 1>}, {transform_indices = @transform_6, window_bounds = array<i64: 1, 4, 128>}]} {
    %c0 = arith.constant 0 : index
    %c0_0 = arith.constant 0 : index
    %c0_1 = arith.constant 0 : index
    %0 = vector.load %arg1[%c0, %c0_0, %c0_1] : memref<1x128x8xf32, #tpu.memory_space<vmem>>, vector<1x128x8xf32>
    %1 = vector.shape_cast %0 : vector<1x128x8xf32> to vector<128x8xf32>
    %c0_2 = arith.constant 0 : index
    %c0_3 = arith.constant 0 : index
    %2 = vector.load %arg2[%c0_2, %c0_3] : memref<8x128xf32, #tpu.memory_space<vmem>>, vector<8x128xf32>
    %cst = arith.constant dense<0.000000e+00> : vector<128x128xf32>
    %3 = tpu.matmul %1, %2, %cst {dimension_numbers = #tpu.dot_dimension_numbers<[1], [0], [0], [1], [0, 0, 1, 1], [], []>} : vector<128x8xf32>, vector<8x128xf32>, vector<128x128xf32> -> vector<128x128xf32>
    %c0_4 = arith.constant 0 : index
    %c0_5 = arith.constant 0 : index
    %4 = vector.load %arg4[%c0_4, %c0_5] : memref<1x128xf32, #tpu.memory_space<vmem>>, vector<1x128xf32>
    %5 = vector.broadcast %4 : vector<1x128xf32> to vector<128x128xf32>
    %6 = arith.addf %3, %5 : vector<128x128xf32>
    %c0_6 = arith.constant 0 : index
    %c0_7 = arith.constant 0 : index
    %7 = vector.load %arg8[%c0_6, %c0_7] : memref<128x128xf32, #tpu.memory_space<vmem>>, vector<128x128xf32>
    tpu.vector_store %arg8[%c0_6, %c0_7], %6 {strides = array<i32>} : memref<128x128xf32, #tpu.memory_space<vmem>>, vector<128x128xf32>,
    %cst_8 = arith.constant 0.000000e+00 : f32
    %8 = vector.broadcast %cst_8 : f32 to vector<16x32xf32>
    %c0_i32 = arith.constant 0 : i32
    %c16_i32 = arith.constant 16 : i32
    %9 = arith.muli %c0_i32, %c16_i32 : i32
    %10 = tpu.assume_multiple %9, 8 : i32
    %11 = arith.index_cast %10 : i32 to index
    %c0_9 = arith.constant 0 : index
    %12 = vector.load %arg8[%11, %c0_9] : memref<128x128xf32, #tpu.memory_space<vmem>>, vector<16x128xf32>
    %c0_10 = arith.constant 0 : index
    %c0_11 = arith.constant 0 : index
    %13 = vector.load %arg3[%c0_10, %c0_11] : memref<32x128xf32, #tpu.memory_space<vmem>>, vector<32x128xf32>
    %cst_12 = arith.constant dense<0.000000e+00> : vector<16x128xf32>
    %14 = tpu.matmul %8, %13, %cst_12 {dimension_numbers = #tpu.dot_dimension_numbers<[1], [0], [0], [1], [0, 0, 1, 1], [], []>} : vector<16x32xf32>, vector<32x128xf32>, vector<16x128xf32> -> vector<16x128xf32>
    %15 = arith.addf %12, %14 : vector<16x128xf32>
    %16 = arith.negf %15 : vector<16x128xf32>
    %17 = math.exp %16 : vector<16x128xf32>
    %cst_13 = arith.constant 1.000000e+00 : f32
    %18 = vector.broadcast %cst_13 : f32 to vector<16x128xf32>
    %19 = arith.addf %18, %17 : vector<16x128xf32>
    %20 = arith.divf %18, %19 : vector<16x128xf32>
    %21 = vector.extract_strided_slice %20 {offsets = [0, 0], sizes = [16, 32], strides = [1, 1]} : vector<16x128xf32> to vector<16x32xf32>
    %22 = vector.extract_strided_slice %20 {offsets = [0, 32], sizes = [16, 32], strides = [1, 1]} : vector<16x128xf32> to vector<16x32xf32>
    %23 = vector.extract_strided_slice %20 {offsets = [0, 64], sizes = [16, 32], strides = [1, 1]} : vector<16x128xf32> to vector<16x32xf32>
    %cst_14 = arith.constant 2.000000e+00 : f32
    %24 = vector.broadcast %cst_14 : f32 to vector<16x32xf32>
    %25 = arith.mulf %24, %23 : vector<16x32xf32>
    %cst_15 = arith.constant 1.000000e+00 : f32
    %26 = vector.broadcast %cst_15 : f32 to vector<16x32xf32>
    %27 = arith.subf %25, %26 : vector<16x32xf32>
    %28 = vector.extract_strided_slice %20 {offsets = [0, 96], sizes = [16, 32], strides = [1, 1]} : vector<16x128xf32> to vector<16x32xf32>
    %29 = arith.mulf %22, %8 : vector<16x32xf32>
    %30 = arith.mulf %21, %27 : vector<16x32xf32>
    %31 = arith.addf %29, %30 : vector<16x32xf32>
    %32 = math.tanh %31 : vector<16x32xf32>
    %33 = arith.mulf %28, %32 : vector<16x32xf32>
    %34 = arith.index_cast %10 : i32 to index
    %c0_16 = arith.constant 0 : index
    %35 = vector.load %arg9[%34, %c0_16] : memref<128x32xf32, #tpu.memory_space<vmem>>, vector<16x32xf32>
    tpu.vector_store %arg9[%34, %c0_16], %33 {strides = array<i32>} : memref<128x32xf32, #tpu.memory_space<vmem>>, vector<16x32xf32>,
    %c1_i32 = arith.constant 1 : i32
    %c16_i32_17 = arith.constant 16 : i32
    %36 = arith.muli %c1_i32, %c16_i32_17 : i32
    %37 = tpu.assume_multiple %36, 8 : i32
    %38 = arith.index_cast %37 : i32 to index
    %c0_18 = arith.constant 0 : index
    %39 = vector.load %arg8[%38, %c0_18] : memref<128x128xf32, #tpu.memory_space<vmem>>, vector<16x128xf32>
    %c0_19 = arith.constant 0 : index
    %c0_20 = arith.constant 0 : index
    %40 = vector.load %arg3[%c0_19, %c0_20] : memref<32x128xf32, #tpu.memory_space<vmem>>, vector<32x128xf32>
    %cst_21 = arith.constant dense<0.000000e+00> : vector<16x128xf32>
    %41 = tpu.matmul %33, %40, %cst_21 {dimension_numbers = #tpu.dot_dimension_numbers<[1], [0], [0], [1], [0, 0, 1, 1], [], []>} : vector<16x32xf32>, vector<32x128xf32>, vector<16x128xf32> -> vector<16x128xf32>
    %42 = arith.addf %39, %41 : vector<16x128xf32>
    %43 = arith.negf %42 : vector<16x128xf32>
    %44 = math.exp %43 : vector<16x128xf32>
    %cst_22 = arith.constant 1.000000e+00 : f32
    %45 = vector.broadcast %cst_22 : f32 to vector<16x128xf32>
    %46 = arith.addf %45, %44 : vector<16x128xf32>
    %47 = arith.divf %45, %46 : vector<16x128xf32>
    %48 = vector.extract_strided_slice %47 {offsets = [0, 0], sizes = [16, 32], strides = [1, 1]} : vector<16x128xf32> to vector<16x32xf32>
    %49 = vector.extract_strided_slice %47 {offsets = [0, 32], sizes = [16, 32], strides = [1, 1]} : vector<16x128xf32> to vector<16x32xf32>
    %50 = vector.extract_strided_slice %47 {offsets = [0, 64], sizes = [16, 32], strides = [1, 1]} : vector<16x128xf32> to vector<16x32xf32>
    %cst_23 = arith.constant 2.000000e+00 : f32
    %51 = vector.broadcast %cst_23 : f32 to vector<16x32xf32>
    %52 = arith.mulf %51, %50 : vector<16x32xf32>
    %cst_24 = arith.constant 1.000000e+00 : f32
    %53 = vector.broadcast %cst_24 : f32 to vector<16x32xf32>
    %54 = arith.subf %52, %53 : vector<16x32xf32>
    %55 = vector.extract_strided_slice %47 {offsets = [0, 96], sizes = [16, 32], strides = [1, 1]} : vector<16x128xf32> to vector<16x32xf32>
    %56 = arith.mulf %49, %31 : vector<16x32xf32>
    %57 = arith.mulf %48, %54 : vector<16x32xf32>
    %58 = arith.addf %56, %57 : vector<16x32xf32>
    %59 = math.tanh %58 : vector<16x32xf32>
    %60 = arith.mulf %55, %59 : vector<16x32xf32>
    %61 = arith.index_cast %37 : i32 to index
    %c0_25 = arith.constant 0 : index
    %62 = vector.load %arg9[%61, %c0_25] : memref<128x32xf32, #tpu.memory_space<vmem>>, vector<16x32xf32>
    tpu.vector_store %arg9[%61, %c0_25], %60 {strides = array<i32>} : memref<128x32xf32, #tpu.memory_space<vmem>>, vector<16x32xf32>,
    %c2_i32 = arith.constant 2 : i32
    %c16_i32_26 = arith.constant 16 : i32
    %63 = arith.muli %c2_i32, %c16_i32_26 : i32
    %64 = tpu.assume_multiple %63, 8 : i32
    %65 = arith.index_cast %64 : i32 to index
    %c0_27 = arith.constant 0 : index
    %66 = vector.load %arg8[%65, %c0_27] : memref<128x128xf32, #tpu.memory_space<vmem>>, vector<16x128xf32>
    %c0_28 = arith.constant 0 : index
    %c0_29 = arith.constant 0 : index
    %67 = vector.load %arg3[%c0_28, %c0_29] : memref<32x128xf32, #tpu.memory_space<vmem>>, vector<32x128xf32>
    %cst_30 = arith.constant dense<0.000000e+00> : vector<16x128xf32>
    %68 = tpu.matmul %60, %67, %cst_30 {dimension_numbers = #tpu.dot_dimension_numbers<[1], [0], [0], [1], [0, 0, 1, 1], [], []>} : vector<16x32xf32>, vector<32x128xf32>, vector<16x128xf32> -> vector<16x128xf32>
    %69 = arith.addf %66, %68 : vector<16x128xf32>
    %70 = arith.negf %69 : vector<16x128xf32>
    %71 = math.exp %70 : vector<16x128xf32>
    %cst_31 = arith.constant 1.000000e+00 : f32
    %72 = vector.broadcast %cst_31 : f32 to vector<16x128xf32>
    %73 = arith.addf %72, %71 : vector<16x128xf32>
    %74 = arith.divf %72, %73 : vector<16x128xf32>
    %75 = vector.extract_strided_slice %74 {offsets = [0, 0], sizes = [16, 32], strides = [1, 1]} : vector<16x128xf32> to vector<16x32xf32>
    %76 = vector.extract_strided_slice %74 {offsets = [0, 32], sizes = [16, 32], strides = [1, 1]} : vector<16x128xf32> to vector<16x32xf32>
    %77 = vector.extract_strided_slice %74 {offsets = [0, 64], sizes = [16, 32], strides = [1, 1]} : vector<16x128xf32> to vector<16x32xf32>
    %cst_32 = arith.constant 2.000000e+00 : f32
    %78 = vector.broadcast %cst_32 : f32 to vector<16x32xf32>
    %79 = arith.mulf %78, %77 : vector<16x32xf32>
    %cst_33 = arith.constant 1.000000e+00 : f32
    %80 = vector.broadcast %cst_33 : f32 to vector<16x32xf32>
    %81 = arith.subf %79, %80 : vector<16x32xf32>
    %82 = vector.extract_strided_slice %74 {offsets = [0, 96], sizes = [16, 32], strides = [1, 1]} : vector<16x128xf32> to vector<16x32xf32>
    %83 = arith.mulf %76, %58 : vector<16x32xf32>
    %84 = arith.mulf %75, %81 : vector<16x32xf32>
    %85 = arith.addf %83, %84 : vector<16x32xf32>
    %86 = math.tanh %85 : vector<16x32xf32>
    %87 = arith.mulf %82, %86 : vector<16x32xf32>
    %88 = arith.index_cast %64 : i32 to index
    %c0_34 = arith.constant 0 : index
    %89 = vector.load %arg9[%88, %c0_34] : memref<128x32xf32, #tpu.memory_space<vmem>>, vector<16x32xf32>
    tpu.vector_store %arg9[%88, %c0_34], %87 {strides = array<i32>} : memref<128x32xf32, #tpu.memory_space<vmem>>, vector<16x32xf32>,
    %c3_i32 = arith.constant 3 : i32
    %c16_i32_35 = arith.constant 16 : i32
    %90 = arith.muli %c3_i32, %c16_i32_35 : i32
    %91 = tpu.assume_multiple %90, 8 : i32
    %92 = arith.index_cast %91 : i32 to index
    %c0_36 = arith.constant 0 : index
    %93 = vector.load %arg8[%92, %c0_36] : memref<128x128xf32, #tpu.memory_space<vmem>>, vector<16x128xf32>
    %c0_37 = arith.constant 0 : index
    %c0_38 = arith.constant 0 : index
    %94 = vector.load %arg3[%c0_37, %c0_38] : memref<32x128xf32, #tpu.memory_space<vmem>>, vector<32x128xf32>
    %cst_39 = arith.constant dense<0.000000e+00> : vector<16x128xf32>
    %95 = tpu.matmul %87, %94, %cst_39 {dimension_numbers = #tpu.dot_dimension_numbers<[1], [0], [0], [1], [0, 0, 1, 1], [], []>} : vector<16x32xf32>, vector<32x128xf32>, vector<16x128xf32> -> vector<16x128xf32>
    %96 = arith.addf %93, %95 : vector<16x128xf32>
    %97 = arith.negf %96 : vector<16x128xf32>
    %98 = math.exp %97 : vector<16x128xf32>
    %cst_40 = arith.constant 1.000000e+00 : f32
    %99 = vector.broadcast %cst_40 : f32 to vector<16x128xf32>
    %100 = arith.addf %99, %98 : vector<16x128xf32>
    %101 = arith.divf %99, %100 : vector<16x128xf32>
    %102 = vector.extract_strided_slice %101 {offsets = [0, 0], sizes = [16, 32], strides = [1, 1]} : vector<16x128xf32> to vector<16x32xf32>
    %103 = vector.extract_strided_slice %101 {offsets = [0, 32], sizes = [16, 32], strides = [1, 1]} : vector<16x128xf32> to vector<16x32xf32>
    %104 = vector.extract_strided_slice %101 {offsets = [0, 64], sizes = [16, 32], strides = [1, 1]} : vector<16x128xf32> to vector<16x32xf32>
    %cst_41 = arith.constant 2.000000e+00 : f32
    %105 = vector.broadcast %cst_41 : f32 to vector<16x32xf32>
    %106 = arith.mulf %105, %104 : vector<16x32xf32>
    %cst_42 = arith.constant 1.000000e+00 : f32
    %107 = vector.broadcast %cst_42 : f32 to vector<16x32xf32>
    %108 = arith.subf %106, %107 : vector<16x32xf32>
    %109 = vector.extract_strided_slice %101 {offsets = [0, 96], sizes = [16, 32], strides = [1, 1]} : vector<16x128xf32> to vector<16x32xf32>
    %110 = arith.mulf %103, %85 : vector<16x32xf32>
    %111 = arith.mulf %102, %108 : vector<16x32xf32>
    %112 = arith.addf %110, %111 : vector<16x32xf32>
    %113 = math.tanh %112 : vector<16x32xf32>
    %114 = arith.mulf %109, %113 : vector<16x32xf32>
    %115 = arith.index_cast %91 : i32 to index
    %c0_43 = arith.constant 0 : index
    %116 = vector.load %arg9[%115, %c0_43] : memref<128x32xf32, #tpu.memory_space<vmem>>, vector<16x32xf32>
    tpu.vector_store %arg9[%115, %c0_43], %114 {strides = array<i32>} : memref<128x32xf32, #tpu.memory_space<vmem>>, vector<16x32xf32>,
    %c4_i32 = arith.constant 4 : i32
    %c16_i32_44 = arith.constant 16 : i32
    %117 = arith.muli %c4_i32, %c16_i32_44 : i32
    %118 = tpu.assume_multiple %117, 8 : i32
    %119 = arith.index_cast %118 : i32 to index
    %c0_45 = arith.constant 0 : index
    %120 = vector.load %arg8[%119, %c0_45] : memref<128x128xf32, #tpu.memory_space<vmem>>, vector<16x128xf32>
    %c0_46 = arith.constant 0 : index
    %c0_47 = arith.constant 0 : index
    %121 = vector.load %arg3[%c0_46, %c0_47] : memref<32x128xf32, #tpu.memory_space<vmem>>, vector<32x128xf32>
    %cst_48 = arith.constant dense<0.000000e+00> : vector<16x128xf32>
    %122 = tpu.matmul %114, %121, %cst_48 {dimension_numbers = #tpu.dot_dimension_numbers<[1], [0], [0], [1], [0, 0, 1, 1], [], []>} : vector<16x32xf32>, vector<32x128xf32>, vector<16x128xf32> -> vector<16x128xf32>
    %123 = arith.addf %120, %122 : vector<16x128xf32>
    %124 = arith.negf %123 : vector<16x128xf32>
    %125 = math.exp %124 : vector<16x128xf32>
    %cst_49 = arith.constant 1.000000e+00 : f32
    %126 = vector.broadcast %cst_49 : f32 to vector<16x128xf32>
    %127 = arith.addf %126, %125 : vector<16x128xf32>
    %128 = arith.divf %126, %127 : vector<16x128xf32>
    %129 = vector.extract_strided_slice %128 {offsets = [0, 0], sizes = [16, 32], strides = [1, 1]} : vector<16x128xf32> to vector<16x32xf32>
    %130 = vector.extract_strided_slice %128 {offsets = [0, 32], sizes = [16, 32], strides = [1, 1]} : vector<16x128xf32> to vector<16x32xf32>
    %131 = vector.extract_strided_slice %128 {offsets = [0, 64], sizes = [16, 32], strides = [1, 1]} : vector<16x128xf32> to vector<16x32xf32>
    %cst_50 = arith.constant 2.000000e+00 : f32
    %132 = vector.broadcast %cst_50 : f32 to vector<16x32xf32>
    %133 = arith.mulf %132, %131 : vector<16x32xf32>
    %cst_51 = arith.constant 1.000000e+00 : f32
    %134 = vector.broadcast %cst_51 : f32 to vector<16x32xf32>
    %135 = arith.subf %133, %134 : vector<16x32xf32>
    %136 = vector.extract_strided_slice %128 {offsets = [0, 96], sizes = [16, 32], strides = [1, 1]} : vector<16x128xf32> to vector<16x32xf32>
    %137 = arith.mulf %130, %112 : vector<16x32xf32>
    %138 = arith.mulf %129, %135 : vector<16x32xf32>
    %139 = arith.addf %137, %138 : vector<16x32xf32>
    %140 = math.tanh %139 : vector<16x32xf32>
    %141 = arith.mulf %136, %140 : vector<16x32xf32>
    %142 = arith.index_cast %118 : i32 to index
    %c0_52 = arith.constant 0 : index
    %143 = vector.load %arg9[%142, %c0_52] : memref<128x32xf32, #tpu.memory_space<vmem>>, vector<16x32xf32>
    tpu.vector_store %arg9[%142, %c0_52], %141 {strides = array<i32>} : memref<128x32xf32, #tpu.memory_space<vmem>>, vector<16x32xf32>,
    %c5_i32 = arith.constant 5 : i32
    %c16_i32_53 = arith.constant 16 : i32
    %144 = arith.muli %c5_i32, %c16_i32_53 : i32
    %145 = tpu.assume_multiple %144, 8 : i32
    %146 = arith.index_cast %145 : i32 to index
    %c0_54 = arith.constant 0 : index
    %147 = vector.load %arg8[%146, %c0_54] : memref<128x128xf32, #tpu.memory_space<vmem>>, vector<16x128xf32>
    %c0_55 = arith.constant 0 : index
    %c0_56 = arith.constant 0 : index
    %148 = vector.load %arg3[%c0_55, %c0_56] : memref<32x128xf32, #tpu.memory_space<vmem>>, vector<32x128xf32>
    %cst_57 = arith.constant dense<0.000000e+00> : vector<16x128xf32>
    %149 = tpu.matmul %141, %148, %cst_57 {dimension_numbers = #tpu.dot_dimension_numbers<[1], [0], [0], [1], [0, 0, 1, 1], [], []>} : vector<16x32xf32>, vector<32x128xf32>, vector<16x128xf32> -> vector<16x128xf32>
    %150 = arith.addf %147, %149 : vector<16x128xf32>
    %151 = arith.negf %150 : vector<16x128xf32>
    %152 = math.exp %151 : vector<16x128xf32>
    %cst_58 = arith.constant 1.000000e+00 : f32
    %153 = vector.broadcast %cst_58 : f32 to vector<16x128xf32>
    %154 = arith.addf %153, %152 : vector<16x128xf32>
    %155 = arith.divf %153, %154 : vector<16x128xf32>
    %156 = vector.extract_strided_slice %155 {offsets = [0, 0], sizes = [16, 32], strides = [1, 1]} : vector<16x128xf32> to vector<16x32xf32>
    %157 = vector.extract_strided_slice %155 {offsets = [0, 32], sizes = [16, 32], strides = [1, 1]} : vector<16x128xf32> to vector<16x32xf32>
    %158 = vector.extract_strided_slice %155 {offsets = [0, 64], sizes = [16, 32], strides = [1, 1]} : vector<16x128xf32> to vector<16x32xf32>
    %cst_59 = arith.constant 2.000000e+00 : f32
    %159 = vector.broadcast %cst_59 : f32 to vector<16x32xf32>
    %160 = arith.mulf %159, %158 : vector<16x32xf32>
    %cst_60 = arith.constant 1.000000e+00 : f32
    %161 = vector.broadcast %cst_60 : f32 to vector<16x32xf32>
    %162 = arith.subf %160, %161 : vector<16x32xf32>
    %163 = vector.extract_strided_slice %155 {offsets = [0, 96], sizes = [16, 32], strides = [1, 1]} : vector<16x128xf32> to vector<16x32xf32>
    %164 = arith.mulf %157, %139 : vector<16x32xf32>
    %165 = arith.mulf %156, %162 : vector<16x32xf32>
    %166 = arith.addf %164, %165 : vector<16x32xf32>
    %167 = math.tanh %166 : vector<16x32xf32>
    %168 = arith.mulf %163, %167 : vector<16x32xf32>
    %169 = arith.index_cast %145 : i32 to index
    %c0_61 = arith.constant 0 : index
    %170 = vector.load %arg9[%169, %c0_61] : memref<128x32xf32, #tpu.memory_space<vmem>>, vector<16x32xf32>
    tpu.vector_store %arg9[%169, %c0_61], %168 {strides = array<i32>} : memref<128x32xf32, #tpu.memory_space<vmem>>, vector<16x32xf32>,
    %c6_i32 = arith.constant 6 : i32
    %c16_i32_62 = arith.constant 16 : i32
    %171 = arith.muli %c6_i32, %c16_i32_62 : i32
    %172 = tpu.assume_multiple %171, 8 : i32
    %173 = arith.index_cast %172 : i32 to index
    %c0_63 = arith.constant 0 : index
    %174 = vector.load %arg8[%173, %c0_63] : memref<128x128xf32, #tpu.memory_space<vmem>>, vector<16x128xf32>
    %c0_64 = arith.constant 0 : index
    %c0_65 = arith.constant 0 : index
    %175 = vector.load %arg3[%c0_64, %c0_65] : memref<32x128xf32, #tpu.memory_space<vmem>>, vector<32x128xf32>
    %cst_66 = arith.constant dense<0.000000e+00> : vector<16x128xf32>
    %176 = tpu.matmul %168, %175, %cst_66 {dimension_numbers = #tpu.dot_dimension_numbers<[1], [0], [0], [1], [0, 0, 1, 1], [], []>} : vector<16x32xf32>, vector<32x128xf32>, vector<16x128xf32> -> vector<16x128xf32>
    %177 = arith.addf %174, %176 : vector<16x128xf32>
    %178 = arith.negf %177 : vector<16x128xf32>
    %179 = math.exp %178 : vector<16x128xf32>
    %cst_67 = arith.constant 1.000000e+00 : f32
    %180 = vector.broadcast %cst_67 : f32 to vector<16x128xf32>
    %181 = arith.addf %180, %179 : vector<16x128xf32>
    %182 = arith.divf %180, %181 : vector<16x128xf32>
    %183 = vector.extract_strided_slice %182 {offsets = [0, 0], sizes = [16, 32], strides = [1, 1]} : vector<16x128xf32> to vector<16x32xf32>
    %184 = vector.extract_strided_slice %182 {offsets = [0, 32], sizes = [16, 32], strides = [1, 1]} : vector<16x128xf32> to vector<16x32xf32>
    %185 = vector.extract_strided_slice %182 {offsets = [0, 64], sizes = [16, 32], strides = [1, 1]} : vector<16x128xf32> to vector<16x32xf32>
    %cst_68 = arith.constant 2.000000e+00 : f32
    %186 = vector.broadcast %cst_68 : f32 to vector<16x32xf32>
    %187 = arith.mulf %186, %185 : vector<16x32xf32>
    %cst_69 = arith.constant 1.000000e+00 : f32
    %188 = vector.broadcast %cst_69 : f32 to vector<16x32xf32>
    %189 = arith.subf %187, %188 : vector<16x32xf32>
    %190 = vector.extract_strided_slice %182 {offsets = [0, 96], sizes = [16, 32], strides = [1, 1]} : vector<16x128xf32> to vector<16x32xf32>
    %191 = arith.mulf %184, %166 : vector<16x32xf32>
    %192 = arith.mulf %183, %189 : vector<16x32xf32>
    %193 = arith.addf %191, %192 : vector<16x32xf32>
    %194 = math.tanh %193 : vector<16x32xf32>
    %195 = arith.mulf %190, %194 : vector<16x32xf32>
    %196 = arith.index_cast %172 : i32 to index
    %c0_70 = arith.constant 0 : index
    %197 = vector.load %arg9[%196, %c0_70] : memref<128x32xf32, #tpu.memory_space<vmem>>, vector<16x32xf32>
    tpu.vector_store %arg9[%196, %c0_70], %195 {strides = array<i32>} : memref<128x32xf32, #tpu.memory_space<vmem>>, vector<16x32xf32>,
    %c7_i32 = arith.constant 7 : i32
    %c16_i32_71 = arith.constant 16 : i32
    %198 = arith.muli %c7_i32, %c16_i32_71 : i32
    %199 = tpu.assume_multiple %198, 8 : i32
    %200 = arith.index_cast %199 : i32 to index
    %c0_72 = arith.constant 0 : index
    %201 = vector.load %arg8[%200, %c0_72] : memref<128x128xf32, #tpu.memory_space<vmem>>, vector<16x128xf32>
    %c0_73 = arith.constant 0 : index
    %c0_74 = arith.constant 0 : index
    %202 = vector.load %arg3[%c0_73, %c0_74] : memref<32x128xf32, #tpu.memory_space<vmem>>, vector<32x128xf32>
    %cst_75 = arith.constant dense<0.000000e+00> : vector<16x128xf32>
    %203 = tpu.matmul %195, %202, %cst_75 {dimension_numbers = #tpu.dot_dimension_numbers<[1], [0], [0], [1], [0, 0, 1, 1], [], []>} : vector<16x32xf32>, vector<32x128xf32>, vector<16x128xf32> -> vector<16x128xf32>
    %204 = arith.addf %201, %203 : vector<16x128xf32>
    %205 = arith.negf %204 : vector<16x128xf32>
    %206 = math.exp %205 : vector<16x128xf32>
    %cst_76 = arith.constant 1.000000e+00 : f32
    %207 = vector.broadcast %cst_76 : f32 to vector<16x128xf32>
    %208 = arith.addf %207, %206 : vector<16x128xf32>
    %209 = arith.divf %207, %208 : vector<16x128xf32>
    %210 = vector.extract_strided_slice %209 {offsets = [0, 0], sizes = [16, 32], strides = [1, 1]} : vector<16x128xf32> to vector<16x32xf32>
    %211 = vector.extract_strided_slice %209 {offsets = [0, 32], sizes = [16, 32], strides = [1, 1]} : vector<16x128xf32> to vector<16x32xf32>
    %212 = vector.extract_strided_slice %209 {offsets = [0, 64], sizes = [16, 32], strides = [1, 1]} : vector<16x128xf32> to vector<16x32xf32>
    %cst_77 = arith.constant 2.000000e+00 : f32
    %213 = vector.broadcast %cst_77 : f32 to vector<16x32xf32>
    %214 = arith.mulf %213, %212 : vector<16x32xf32>
    %cst_78 = arith.constant 1.000000e+00 : f32
    %215 = vector.broadcast %cst_78 : f32 to vector<16x32xf32>
    %216 = arith.subf %214, %215 : vector<16x32xf32>
    %217 = vector.extract_strided_slice %209 {offsets = [0, 96], sizes = [16, 32], strides = [1, 1]} : vector<16x128xf32> to vector<16x32xf32>
    %218 = arith.mulf %211, %193 : vector<16x32xf32>
    %219 = arith.mulf %210, %216 : vector<16x32xf32>
    %220 = arith.addf %218, %219 : vector<16x32xf32>
    %221 = math.tanh %220 : vector<16x32xf32>
    %222 = arith.mulf %217, %221 : vector<16x32xf32>
    %223 = arith.index_cast %199 : i32 to index
    %c0_79 = arith.constant 0 : index
    %224 = vector.load %arg9[%223, %c0_79] : memref<128x32xf32, #tpu.memory_space<vmem>>, vector<16x32xf32>
    tpu.vector_store %arg9[%223, %c0_79], %222 {strides = array<i32>} : memref<128x32xf32, #tpu.memory_space<vmem>>, vector<16x32xf32>,
    %c8_i32 = arith.constant 8 : i32
    %c0_80 = arith.constant 0 : index
    %c0_81 = arith.constant 0 : index
    %225 = vector.load %arg5[%c0_80, %c0_81] : memref<4x32xf32, #tpu.memory_space<vmem>>, vector<4x32xf32>
    %c0_82 = arith.constant 0 : index
    %c0_83 = arith.constant 0 : index
    %226 = vector.load %arg9[%c0_82, %c0_83] : memref<128x32xf32, #tpu.memory_space<vmem>>, vector<128x32xf32>
    %cst_84 = arith.constant dense<0.000000e+00> : vector<4x128xf32>
    %227 = tpu.matmul %225, %226, %cst_84 {dimension_numbers = #tpu.dot_dimension_numbers<[1], [1], [0], [0], [0, 0, 1, 0], [], []>} : vector<4x32xf32>, vector<128x32xf32>, vector<4x128xf32> -> vector<4x128xf32>
    %c0_85 = arith.constant 0 : index
    %c0_86 = arith.constant 0 : index
    %228 = vector.load %arg6[%c0_85, %c0_86] : memref<4x1xf32, #tpu.memory_space<vmem>>, vector<4x1xf32>
    %229 = vector.broadcast %228 : vector<4x1xf32> to vector<4x128xf32>
    %230 = arith.addf %227, %229 : vector<4x128xf32>
    %c0_87 = arith.constant 0 : index
    %c0_88 = arith.constant 0 : index
    %c0_89 = arith.constant 0 : index
    %231 = vector.load %arg7[%c0_87, %c0_88, %c0_89] : memref<1x4x128xf32, #tpu.memory_space<vmem>>, vector<1x4x128xf32>
    %232 = vector.shape_cast %231 : vector<1x4x128xf32> to vector<4x128xf32>
    %233 = vector.shape_cast %230 : vector<4x128xf32> to vector<1x4x128xf32>
    tpu.vector_store %arg7[%c0_87, %c0_88, %c0_89], %233 {strides = array<i32>} : memref<1x4x128xf32, #tpu.memory_space<vmem>>, vector<1x4x128xf32>,
    return
  }
  func.func @transform_0(%arg0: i32) -> (i32, i32, i32) {
    %c0_i32 = arith.constant 0 : i32
    %c0_i32_0 = arith.constant 0 : i32
    %c0_i32_1 = arith.constant 0 : i32
    return %arg0, %c0_i32, %c0_i32_0 : i32, i32, i32
  }
  func.func @transform_1(%arg0: i32) -> (i32, i32) {
    %c0_i32 = arith.constant 0 : i32
    %c0_i32_0 = arith.constant 0 : i32
    %c0_i32_1 = arith.constant 0 : i32
    return %c0_i32, %c0_i32_0 : i32, i32
  }
  func.func @transform_2(%arg0: i32) -> (i32, i32) {
    %c0_i32 = arith.constant 0 : i32
    %c0_i32_0 = arith.constant 0 : i32
    %c0_i32_1 = arith.constant 0 : i32
    return %c0_i32, %c0_i32_0 : i32, i32
  }
  func.func @transform_3(%arg0: i32) -> (i32, i32) {
    %c0_i32 = arith.constant 0 : i32
    %c0_i32_0 = arith.constant 0 : i32
    %c0_i32_1 = arith.constant 0 : i32
    return %c0_i32, %c0_i32_0 : i32, i32
  }
  func.func @transform_4(%arg0: i32) -> (i32, i32) {
    %c0_i32 = arith.constant 0 : i32
    %c0_i32_0 = arith.constant 0 : i32
    %c0_i32_1 = arith.constant 0 : i32
    return %c0_i32, %c0_i32_0 : i32, i32
  }
  func.func @transform_5(%arg0: i32) -> (i32, i32) {
    %c0_i32 = arith.constant 0 : i32
    %c0_i32_0 = arith.constant 0 : i32
    %c0_i32_1 = arith.constant 0 : i32
    return %c0_i32, %c0_i32_0 : i32, i32
  }
  func.func @transform_6(%arg0: i32) -> (i32, i32, i32) {
    %c0_i32 = arith.constant 0 : i32
    %c0_i32_0 = arith.constant 0 : i32
    %c0_i32_1 = arith.constant 0 : i32
    return %arg0, %c0_i32, %c0_i32_0 : i32, i32, i32
  }
}

</mosaic_0001>

<bundles_post_ra>
// kernel: tpu_custom_call.1
= control target key start
LH: loop header
LB: loop body
LE: loop exit
PB: predicated region body
PF: predicated region fallthrough
CT: control target
= control target key end

     0   :  { %vm48_vm0 = vcmask 64512   ;;  %v2174_v7 = vmov 0.0   ;;  %s2546_s0 = inlined_call_operand.vmem [shape: f32[1,128,8], index: 0, kind: input, shape index: {}]   ;;  %s2547_s1 = inlined_call_operand.vmem [shape: f32[8,128], index: 1, kind: input, shape index: {}]   ;;  %s2548_s2 = inlined_call_operand.vmem [shape: f32[32,128], index: 2, kind: input, shape index: {}]   ;;  %s2549_s3 = inlined_call_operand.vmem [shape: f32[1,128], index: 3, kind: input, shape index: {}]   ;;  %s2550_s4 = inlined_call_operand.vmem [shape: f32[4,32], index: 4, kind: input, shape index: {}]   ;;  %s2551_s5 = inlined_call_operand.vmem [shape: f32[4,1], index: 5, kind: input, shape index: {}]   ;;  %s2552_s6 = inlined_call_operand.hbm [shape: f32[1,4,128], index: 6, kind: output, shape index: {}]  }
   0x1   :  { %v260_v0 = vld [vmem:[%s2548_s2] sm:$0xff]  ;;  %v261_v1 = vld [vmem:[%s2548_s2 + $0x8] sm:$0xff]  ;;  %v262_v5 = vld [vmem:[%s2548_s2 + $0x10] sm:$0xff]  ;;  %1803 = vmatprep.mubr.f32.mxu0 %v2174_v7 }
   0x2   :  { %v40_v2 = vld [vmem:[%s2547_s1] sm:$0xff]  ;;  %v2225_v3 = vpack.c.bf16 %v261_v1, %v260_v0  ;;  %v263_v6 = vld [vmem:[%s2548_s2 + $0x18] sm:$0xff]  ;;  %v25_v9 = vld [vmem:[%s2546_s0 + $0x8] sm:$0xff] }
   0x3   :  { %1769 = vmatprep.subr.mxu1 %v40_v2  ;;  %v24_v4 = vld [vmem:[%s2546_s0] sm:$0xff]  ;;  %v2238_v8 = vpack.c.bf16 %v263_v6, %v262_v5 }
   0x4   :  { %1770 = vmatpush3.msra.mxu1 %v40_v2  ;;  %1771 = vmatprep.mubr.msk.f32.mxu1 %vm48_vm0, %v24_v4 }
   0x5   :  { %11 = vsyncpa [#allocation5], 0  ;;  %1919 = vmatprep.subr.bf16.mxu0 %v2225_v3  ;;  %1772 = vmatmul.mubr.msk.f32.vlgmr.msra.gmra.mrb[0].mxu1 %vm48_vm0, %v25_v9  ;;  %v2257_v12 = vld [vmem:[%s2549_s3] ss:$0 sm:$0xff]  ;;  %s2175_s3 = smov 64   ;;  %s2176_s11 = smov 32  }
   0x6   :  { %1921 = vmatpush3.bf16.msra.mxu0 %v2225_v3  ;;  %v26_v43 = vld [vmem:[%s2546_s0 + $0x10] sm:$0xff]  ;;  %v27_v44 = vld [vmem:[%s2546_s0 + $0x18] sm:$0xff]  ;;  %v2177_v45 = vmov 0.0|0.0   ;;  %vm264_vm1 = vcmask 261120   ;;  %vm2178_vm3 = vmmov 0  }
   0x7   :  { %1923 = vmatprep.subr.bf16.mxu0 %v2238_v8  ;;  %1774 = vmatprep.mubr.msk.f32.mxu1 %vm48_vm0, %v26_v43  ;;  %vm2294_vm2 = vmpackc.low %vm264_vm1, %vm264_vm1 }
   0x8   :  { %1982 = vmatprep.subr.bf16.mxu1 %v2177_v45 }
   0x9   :  { %1775 = vmatmul.mubr.msk.f32.gmra.mrb[2].mxu1 %vm48_vm0, %v27_v44 }
   0xa   :  { %1925 = vmatpush3.bf16.msra.mxu0 %v2238_v8 }
   0xb   :  { %1927 = vmatprep.subr.bf16.mxu0 %v2225_v3 }
   0xd   :  { %1804 = vmatmul.mubr.f32.vlgmr.msra.gmra.mrb[0].mxu0 %v2174_v7 }
   0xe   :  { %1929 = vmatpush3.bf16.msra.mxu0 %v2225_v3 }
   0xf   :  { %1931 = vmatprep.subr.bf16.mxu0 %v2238_v8 }
  0x12   :  { %1933 = vmatpush3.bf16.msra.mxu0 %v2238_v8 }
  0x13   :  { %1935 = vmatprep.subr.bf16.mxu0 %v2225_v3 }
  0xd8   :  { %v1773_v10 = vpop.f32.mrb[0].mxu1 }
  0xd9   :  { %v163_v11 = vpop.f32.mrb[1].mxu1  ;;  %v169_v13 = vadd.f32 %v1773_v10, %v2257_v12 }
  0xda   :  { %v164_v14 = vadd.f32 %v2257_v12, %v163_v11 }
  0xdc   :  { %v1776_v56 = vpop.f32.mrb[2].mxu1 }
  0xdd   :  { %v173_v57 = vpop.f32.mrb[3].mxu1  ;;  %v179_v58 = vadd.f32 %v1776_v56, %v2257_v12 }
  0xde   :  { %v174_v59 = vadd.f32 %v2257_v12, %v173_v57 }
  0xe0   :  { %v1805_v15 = vpop.f32.mrb[0].mxu0 }
  0xe1   :  { %v344_v16 = vadd.f32 %v1805_v15, %v169_v13  ;;  %v334_v17 = vpop.f32.mrb[1].mxu0 }
  0xe2   :  { %v343_v18 = vadd.f32 %v334_v17, %v164_v14 }
  0xe3   :  { %v1625_v19 = vmul.f32 -1.442695, %v344_v16 }
  0xe4   :  { %v1624_v20 = vmul.f32 -1.442695, %v343_v18 }
  0xe5   :  { %2054 = vpow2.f32 %v1625_v19 }
  0xe6   :  { %2056 = vpow2.f32 %v1624_v20 }
  0xef   :  { %v2055_v21 = vpop.eup %2054 }
  0xf0   :  { %v2057_v22 = vpop.eup %2056  ;;  %v352_v23 = vadd.f32 1.0, %v2055_v21 }
  0xf1   :  { %v351_v24 = vadd.f32 1.0, %v2057_v22 }
  0xf2   :  { %2058 = vrcp.f32 %v352_v23 }
  0xf3   :  { %2060 = vrcp.f32 %v351_v24 }
  0xfc   :  { %v2059_v25 = vpop.eup %2058 }
  0xfd   :  { %v2061_v26 = vpop.eup %2060  ;;  %v358_v29 = vmul.f32 2.0, %v2059_v25  ;;  %v362_v38 = vmul.f32 0.0, %v2059_v25 }
  0xfe   :  { %v357_v27 = vmul.f32 2.0, %v2061_v26  ;;  %v361_v35 = vmul.f32 0.0, %v2061_v26 }
  0xff   :  { %v1627_v30 = vadd.f32 -1.0, %v358_v29 }
 0x100   :  { %v1626_v28 = vadd.f32 -1.0, %v357_v27  ;;  %v29_v27 = vld [vmem:[%s2546_s0 + $0x28] sm:$0xff] }
 0x102   :  { %365 = vrot.lane.b32.xlu0 %v1626_v28, %s2175_s3 }
 0x106   :  { %367 = vrot.lane.b32.xlu0 %v1627_v30, %s2175_s3 }
 0x174   :  { %v366_v31 = vpop.permute.xlu0 %365 }
 0x175   :  { %v371_v32 = vmul.f32 %v2061_v26, %v366_v31 }
 0x177   :  { %375 = vrot.lane.b32.xlu1 %v371_v32, %s2176_s11 }
 0x178   :  { %v368_v33 = vpop.permute.xlu0 %367 }
 0x179   :  { %v372_v34 = vmul.f32 %v2059_v25, %v368_v33 }
 0x17b   :  { %377 = vrot.lane.b32.xlu1 %v372_v34, %s2176_s11 }
 0x1e9   :  { %v376_v36 = vpop.permute.xlu1 %375 }
 0x1ea   :  { %v2265_v37 = vadd.f32 %v376_v36, %v361_v35 }
 0x1ec   :  { %2062 = vtanh.f32 %v2265_v37 }
 0x1ed   :  { %v378_v39 = vpop.permute.xlu1 %377 }
 0x1ee   :  { %v2268_v40 = vadd.f32 %v378_v39, %v362_v38 }
 0x1f0   :  { %2064 = vtanh.f32 %v2268_v40 }
 0x1f6   :  { %v2063_v41 = vpop.eup %2062 }
 0x1f7   :  { %387 = vrot.lane.b32.xlu0 %v2063_v41, %s2175_s3 }
 0x1fa   :  { %v2065_v42 = vpop.eup %2064 }
 0x1fb   :  { %389 = vrot.lane.b32.xlu1 %v2065_v42, %s2175_s3 }
 0x269   :  { %v388_v46 = vpop.permute.xlu0 %387 }
 0x26a   :  { %v393_v47 = vmul.f32 %v2061_v26, %v388_v46  ;;  %v28_v26 = vld [vmem:[%s2546_s0 + $0x20] sm:$0xff] }
 0x26b   :  { %1777 = vmatprep.mubr.msk.f32.mxu1 %vm48_vm0, %v28_v26 }
 0x26c   :  { %397 = vrot.lane.b32.xlu0 %v393_v47, %s2176_s11  ;;  %1778 = vmatmul.mubr.msk.f32.gmra.mrb[4].mxu1 %vm48_vm0, %v29_v27 }
 0x26d   :  { %v390_v48 = vpop.permute.xlu1 %389 }
 0x26e   :  { %v394_v49 = vmul.f32 %v2059_v25, %v390_v48 }
 0x270   :  { %399 = vrot.lane.b32.xlu1 %v394_v49, %s2176_s11 }
 0x2de   :  { %v398_v50 = vpop.permute.xlu0 %397 }
 0x2df   :  { %403 = vst.msk [vmem:[#allocation3] sm:$0xff] %vm264_vm1, %v398_v50  ;;  %1814 = vmatprep.mubr.msk.f32.mxu0 %vm264_vm1, %v398_v50 }
 0x2e2   :  { %v400_v51 = vpop.permute.xlu1 %399 }
 0x2e3   :  { %404 = vst.msk [vmem:[#allocation3 + $0x8] sm:$0xff] %vm264_vm1, %v400_v51  ;;  %1815 = vmatmul.mubr.msk.f32.vlgmr.msra.gmra.mrb[2].mxu0 %vm264_vm1, %v400_v51 }
 0x2e4   :  { %1937 = vmatpush3.bf16.msra.mxu0 %v2225_v3 }
 0x2e5   :  { %1939 = vmatprep.subr.bf16.mxu0 %v2238_v8 }
 0x2e6   :  { %v1449_v52 = vld [vmem:[#allocation3] sm:$0xff] }
 0x2e8   :  { %1941 = vmatpush3.bf16.msra.mxu0 %v2238_v8 }
 0x2e9   :  { %1943 = vmatprep.subr.bf16.mxu0 %v2225_v3 }
 0x2ea   :  { %v1450_v53 = vld [vmem:[#allocation3 + $0x8] sm:$0xff] }
 0x2eb   :  { %v1983_v55 = vpack.c.bf16 %v1450_v53, %v1449_v52 }
 0x2ed   :  { %1985 = vmatpush3.bf16.xpose.msk.msra.mxu1 %vm2294_vm2, %v1983_v55 }
 0x2ee   :  { %1986 = vmatprep.subr.bf16.mxu1 %v2177_v45 }
 0x33f   :  { %v1779_v34 = vpop.f32.mrb[4].mxu1 }
 0x340   :  { %v183_v35 = vpop.f32.mrb[5].mxu1  ;;  %v189_v41 = vadd.f32 %v1779_v34, %v2257_v12 }
 0x341   :  { %v184_v42 = vadd.f32 %v2257_v12, %v183_v35 }
 0x3b6   :  { %v1816_v60 = vpop.f32.mrb[2].mxu0 }
 0x3b7   :  { %v492_v61 = vadd.f32 %v1816_v60, %v179_v58  ;;  %v482_v62 = vpop.f32.mrb[3].mxu0 }
 0x3b8   :  { %v491_v63 = vadd.f32 %v482_v62, %v174_v59 }
 0x3b9   :  { %v1631_v0 = vmul.f32 -1.442695, %v492_v61 }
 0x3ba   :  { %v1630_v1 = vmul.f32 -1.442695, %v491_v63 }
 0x3bb   :  { %2066 = vpow2.f32 %v1631_v0 }
 0x3bc   :  { %2068 = vpow2.f32 %v1630_v1 }
 0x3c5   :  { %v2067_v2 = vpop.eup %2066 }
 0x3c6   :  { %v2069_v4 = vpop.eup %2068  ;;  %v500_v5 = vadd.f32 1.0, %v2067_v2 }
 0x3c7   :  { %v499_v6 = vadd.f32 1.0, %v2069_v4 }
 0x3c8   :  { %2070 = vrcp.f32 %v500_v5 }
 0x3c9   :  { %2072 = vrcp.f32 %v499_v6 }
 0x3d2   :  { %v2071_v9 = vpop.eup %2070 }
 0x3d3   :  { %v2073_v10 = vpop.eup %2072  ;;  %v506_v11 = vmul.f32 2.0, %v2071_v9  ;;  %v510_v20 = vmul.f32 %v2071_v9, %v2268_v40 }
 0x3d4   :  { %v505_v13 = vmul.f32 2.0, %v2073_v10  ;;  %v509_v22 = vmul.f32 %v2073_v10, %v2265_v37 }
 0x3d5   :  { %v1633_v14 = vadd.f32 -1.0, %v506_v11  ;;  %v31_v11 = vld [vmem:[%s2546_s0 + $0x38] sm:$0xff] }
 0x3d6   :  { %v1632_v15 = vadd.f32 -1.0, %v505_v13 }
 0x3d7   :  { %515 = vrot.lane.b32.xlu1 %v1633_v14, %s2175_s3 }
 0x3d8   :  { %513 = vrot.lane.b32.xlu0 %v1632_v15, %s2175_s3 }
 0x449   :  { %v516_v16 = vpop.permute.xlu1 %515 }
 0x44a   :  { %v520_v17 = vmul.f32 %v2071_v9, %v516_v16  ;;  %v514_v18 = vpop.permute.xlu0 %513 }
 0x44b   :  { %v519_v19 = vmul.f32 %v2073_v10, %v514_v18 }
 0x44c   :  { %525 = vrot.lane.b32.xlu1 %v520_v17, %s2176_s11 }
 0x44d   :  { %523 = vrot.lane.b32.xlu0 %v519_v19, %s2176_s11 }
 0x4be   :  { %v526_v21 = vpop.permute.xlu1 %525 }
 0x4bf   :  { %v2309_v23 = vadd.f32 %v526_v21, %v510_v20  ;;  %v524_v24 = vpop.permute.xlu0 %523 }
 0x4c0   :  { %v2311_v25 = vadd.f32 %v524_v24, %v509_v22 }
 0x4c1   :  { %2074 = vtanh.f32 %v2309_v23 }
 0x4c2   :  { %2076 = vtanh.f32 %v2311_v25 }
 0x4cb   :  { %v2075_v28 = vpop.eup %2074 }
 0x4cc   :  { %v2077_v29 = vpop.eup %2076  ;;  %537 = vrot.lane.b32.xlu1 %v2075_v28, %s2175_s3 }
 0x4cd   :  { %535 = vrot.lane.b32.xlu0 %v2077_v29, %s2175_s3 }
 0x53e   :  { %v538_v30 = vpop.permute.xlu1 %537 }
 0x53f   :  { %v542_v31 = vmul.f32 %v2071_v9, %v538_v30  ;;  %v536_v32 = vpop.permute.xlu0 %535 }
 0x540   :  { %v541_v33 = vmul.f32 %v2073_v10, %v536_v32  ;;  %v30_v10 = vld [vmem:[%s2546_s0 + $0x30] sm:$0xff] }
 0x541   :  { %547 = vrot.lane.b32.xlu1 %v542_v31, %s2176_s11  ;;  %1780 = vmatprep.mubr.msk.f32.mxu1 %vm48_vm0, %v30_v10 }
 0x542   :  { %545 = vrot.lane.b32.xlu0 %v541_v33, %s2176_s11  ;;  %1781 = vmatmul.mubr.msk.f32.gmra.mrb[6].mxu1 %vm48_vm0, %v31_v11 }
 0x5b3   :  { %v548_v36 = vpop.permute.xlu1 %547 }
 0x5b4   :  { %553 = vst.msk [vmem:[#allocation3 + $0x18] sm:$0xff] %vm264_vm1, %v548_v36  ;;  %v546_v37 = vpop.permute.xlu0 %545 }
 0x5b5   :  { %552 = vst.msk [vmem:[#allocation3 + $0x10] sm:$0xff] %vm264_vm1, %v546_v37  ;;  %1825 = vmatprep.mubr.msk.f32.mxu0 %vm264_vm1, %v546_v37 }
 0x5b6   :  { %1826 = vmatmul.mubr.msk.f32.vlgmr.msra.gmra.mrb[4].mxu0 %vm264_vm1, %v548_v36 }
 0x5b7   :  { %1945 = vmatpush3.bf16.msra.mxu0 %v2225_v3 }
 0x5b8   :  { %1947 = vmatprep.subr.bf16.mxu0 %v2238_v8 }
 0x5bb   :  { %v1452_v38 = vld [vmem:[#allocation3 + $0x18] sm:$0xff]  ;;  %1949 = vmatpush3.bf16.msra.mxu0 %v2238_v8 }
 0x5bc   :  { %v1451_v39 = vld [vmem:[#allocation3 + $0x10] sm:$0xff]  ;;  %1951 = vmatprep.subr.bf16.mxu0 %v2225_v3 }
 0x5bd   :  { %v1987_v40 = vpack.c.bf16 %v1452_v38, %v1451_v39 }
 0x5bf   :  { %1989 = vmatpush3.bf16.xpose.msk.msra.mxu1 %vm2294_vm2, %v1987_v40 }
 0x5c0   :  { %1990 = vmatprep.subr.bf16.mxu1 %v2177_v45 }
 0x615   :  { %v1782_v19 = vpop.f32.mrb[6].mxu1 }
 0x616   :  { %v193_v20 = vpop.f32.mrb[7].mxu1  ;;  %v199_v26 = vadd.f32 %v1782_v19, %v2257_v12 }
 0x617   :  { %v194_v27 = vadd.f32 %v2257_v12, %v193_v20 }
 0x689   :  { %v1827_v43 = vpop.f32.mrb[4].mxu0 }
 0x68a   :  { %v641_v44 = vadd.f32 %v1827_v43, %v189_v41  ;;  %v631_v46 = vpop.f32.mrb[5].mxu0 }
 0x68b   :  { %v640_v47 = vadd.f32 %v631_v46, %v184_v42 }
 0x68c   :  { %v1637_v48 = vmul.f32 -1.442695, %v641_v44 }
 0x68d   :  { %v1636_v49 = vmul.f32 -1.442695, %v640_v47 }
 0x68e   :  { %2078 = vpow2.f32 %v1637_v48 }
 0x68f   :  { %2080 = vpow2.f32 %v1636_v49 }
 0x698   :  { %v2079_v50 = vpop.eup %2078 }
 0x699   :  { %v2081_v51 = vpop.eup %2080  ;;  %v649_v52 = vadd.f32 1.0, %v2079_v50 }
 0x69a   :  { %v648_v53 = vadd.f32 1.0, %v2081_v51 }
 0x69b   :  { %2082 = vrcp.f32 %v649_v52 }
 0x69c   :  { %2084 = vrcp.f32 %v648_v53 }
 0x6a5   :  { %v2083_v55 = vpop.eup %2082 }
 0x6a6   :  { %v2085_v56 = vpop.eup %2084  ;;  %v655_v57 = vmul.f32 2.0, %v2083_v55  ;;  %v659_v1 = vmul.f32 %v2083_v55, %v2309_v23 }
 0x6a7   :  { %v654_v58 = vmul.f32 2.0, %v2085_v56  ;;  %v658_v4 = vmul.f32 %v2085_v56, %v2311_v25 }
 0x6a8   :  { %v1639_v59 = vadd.f32 -1.0, %v655_v57  ;;  %v33_v57 = vld [vmem:[%s2546_s0 + $0x48] sm:$0xff] }
 0x6a9   :  { %v1638_v60 = vadd.f32 -1.0, %v654_v58 }
 0x6aa   :  { %664 = vrot.lane.b32.xlu1 %v1639_v59, %s2175_s3 }
 0x6ab   :  { %662 = vrot.lane.b32.xlu0 %v1638_v60, %s2175_s3 }
 0x71c   :  { %v665_v61 = vpop.permute.xlu1 %664 }
 0x71d   :  { %v669_v62 = vmul.f32 %v2083_v55, %v665_v61  ;;  %v663_v63 = vpop.permute.xlu0 %662 }
 0x71e   :  { %v668_v0 = vmul.f32 %v2085_v56, %v663_v63 }
 0x71f   :  { %674 = vrot.lane.b32.xlu1 %v669_v62, %s2176_s11 }
 0x720   :  { %672 = vrot.lane.b32.xlu0 %v668_v0, %s2176_s11 }
 0x791   :  { %v675_v2 = vpop.permute.xlu1 %674 }
 0x792   :  { %v2346_v5 = vadd.f32 %v675_v2, %v659_v1  ;;  %v673_v6 = vpop.permute.xlu0 %672 }
 0x793   :  { %v2348_v9 = vadd.f32 %v673_v6, %v658_v4 }
 0x794   :  { %2086 = vtanh.f32 %v2346_v5 }
 0x795   :  { %2088 = vtanh.f32 %v2348_v9 }
 0x79e   :  { %v2087_v13 = vpop.eup %2086 }
 0x79f   :  { %v2089_v14 = vpop.eup %2088  ;;  %686 = vrot.lane.b32.xlu1 %v2087_v13, %s2175_s3 }
 0x7a0   :  { %684 = vrot.lane.b32.xlu0 %v2089_v14, %s2175_s3 }
 0x811   :  { %v687_v15 = vpop.permute.xlu1 %686 }
 0x812   :  { %v691_v16 = vmul.f32 %v2083_v55, %v687_v15  ;;  %v685_v17 = vpop.permute.xlu0 %684 }
 0x813   :  { %v690_v18 = vmul.f32 %v2085_v56, %v685_v17  ;;  %v32_v56 = vld [vmem:[%s2546_s0 + $0x40] sm:$0xff] }
 0x814   :  { %696 = vrot.lane.b32.xlu1 %v691_v16, %s2176_s11  ;;  %1783 = vmatprep.mubr.msk.f32.mxu1 %vm48_vm0, %v32_v56 }
 0x815   :  { %694 = vrot.lane.b32.xlu0 %v690_v18, %s2176_s11  ;;  %1784 = vmatmul.mubr.msk.f32.gmra.mrb[8].mxu1 %vm48_vm0, %v33_v57 }
 0x886   :  { %v697_v21 = vpop.permute.xlu1 %696 }
 0x887   :  { %702 = vst.msk [vmem:[#allocation3 + $0x28] sm:$0xff] %vm264_vm1, %v697_v21  ;;  %v695_v22 = vpop.permute.xlu0 %694 }
 0x888   :  { %701 = vst.msk [vmem:[#allocation3 + $0x20] sm:$0xff] %vm264_vm1, %v695_v22  ;;  %1836 = vmatprep.mubr.msk.f32.mxu0 %vm264_vm1, %v695_v22 }
 0x889   :  { %1837 = vmatmul.mubr.msk.f32.vlgmr.msra.gmra.mrb[6].mxu0 %vm264_vm1, %v697_v21 }
 0x88a   :  { %1953 = vmatpush3.bf16.msra.mxu0 %v2225_v3 }
 0x88b   :  { %1955 = vmatprep.subr.bf16.mxu0 %v2238_v8 }
 0x88e   :  { %v1454_v23 = vld [vmem:[#allocation3 + $0x28] sm:$0xff]  ;;  %1957 = vmatpush3.bf16.msra.mxu0 %v2238_v8 }
 0x88f   :  { %v1453_v24 = vld [vmem:[#allocation3 + $0x20] sm:$0xff]  ;;  %1959 = vmatprep.subr.bf16.mxu0 %v2225_v3 }
 0x890   :  { %v1991_v25 = vpack.c.bf16 %v1454_v23, %v1453_v24 }
 0x892   :  { %1993 = vmatpush3.bf16.xpose.msk.msra.mxu1 %vm2294_vm2, %v1991_v25 }
 0x893   :  { %1994 = vmatprep.subr.bf16.mxu1 %v2177_v45 }
 0x8e8   :  { %v1785_v0 = vpop.f32.mrb[8].mxu1 }
 0x8e9   :  { %v203_v1 = vpop.f32.mrb[9].mxu1  ;;  %v209_v10 = vadd.f32 %v1785_v0, %v2257_v12 }
 0x8ea   :  { %v204_v11 = vadd.f32 %v2257_v12, %v203_v1 }
 0x95c   :  { %v1838_v28 = vpop.f32.mrb[6].mxu0 }
 0x95d   :  { %v790_v29 = vadd.f32 %v1838_v28, %v199_v26  ;;  %v780_v30 = vpop.f32.mrb[7].mxu0 }
 0x95e   :  { %v789_v31 = vadd.f32 %v780_v30, %v194_v27 }
 0x95f   :  { %v1643_v32 = vmul.f32 -1.442695, %v790_v29 }
 0x960   :  { %v1642_v33 = vmul.f32 -1.442695, %v789_v31 }
 0x961   :  { %2090 = vpow2.f32 %v1643_v32 }
 0x962   :  { %2092 = vpow2.f32 %v1642_v33 }
 0x96b   :  { %v2091_v34 = vpop.eup %2090 }
 0x96c   :  { %v2093_v35 = vpop.eup %2092  ;;  %v798_v36 = vadd.f32 1.0, %v2091_v34 }
 0x96d   :  { %v797_v37 = vadd.f32 1.0, %v2093_v35 }
 0x96e   :  { %2094 = vrcp.f32 %v798_v36 }
 0x96f   :  { %2096 = vrcp.f32 %v797_v37 }
 0x978   :  { %v2095_v38 = vpop.eup %2094 }
 0x979   :  { %v2097_v39 = vpop.eup %2096  ;;  %v804_v40 = vmul.f32 2.0, %v2095_v38  ;;  %v808_v49 = vmul.f32 %v2095_v38, %v2346_v5 }
 0x97a   :  { %v803_v41 = vmul.f32 2.0, %v2097_v39  ;;  %v807_v51 = vmul.f32 %v2097_v39, %v2348_v9 }
 0x97b   :  { %v1645_v42 = vadd.f32 -1.0, %v804_v40  ;;  %v35_v40 = vld [vmem:[%s2546_s0 + $0x58] sm:$0xff] }
 0x97c   :  { %v1644_v43 = vadd.f32 -1.0, %v803_v41 }
 0x97d   :  { %813 = vrot.lane.b32.xlu1 %v1645_v42, %s2175_s3 }
 0x97e   :  { %811 = vrot.lane.b32.xlu0 %v1644_v43, %s2175_s3 }
 0x9ef   :  { %v814_v44 = vpop.permute.xlu1 %813 }
 0x9f0   :  { %v818_v46 = vmul.f32 %v2095_v38, %v814_v44  ;;  %v812_v47 = vpop.permute.xlu0 %811 }
 0x9f1   :  { %v817_v48 = vmul.f32 %v2097_v39, %v812_v47 }
 0x9f2   :  { %823 = vrot.lane.b32.xlu1 %v818_v46, %s2176_s11 }
 0x9f3   :  { %821 = vrot.lane.b32.xlu0 %v817_v48, %s2176_s11 }
 0xa64   :  { %v824_v50 = vpop.permute.xlu1 %823 }
 0xa65   :  { %v2383_v52 = vadd.f32 %v824_v50, %v808_v49  ;;  %v822_v53 = vpop.permute.xlu0 %821 }
 0xa66   :  { %v2385_v55 = vadd.f32 %v822_v53, %v807_v51 }
 0xa67   :  { %2098 = vtanh.f32 %v2383_v52 }
 0xa68   :  { %2100 = vtanh.f32 %v2385_v55 }
 0xa71   :  { %v2099_v58 = vpop.eup %2098 }
 0xa72   :  { %v2101_v59 = vpop.eup %2100  ;;  %835 = vrot.lane.b32.xlu1 %v2099_v58, %s2175_s3 }
 0xa73   :  { %833 = vrot.lane.b32.xlu0 %v2101_v59, %s2175_s3 }
 0xae4   :  { %v836_v60 = vpop.permute.xlu1 %835 }
 0xae5   :  { %v840_v61 = vmul.f32 %v2095_v38, %v836_v60  ;;  %v834_v62 = vpop.permute.xlu0 %833 }
 0xae6   :  { %v839_v63 = vmul.f32 %v2097_v39, %v834_v62  ;;  %v34_v39 = vld [vmem:[%s2546_s0 + $0x50] sm:$0xff] }
 0xae7   :  { %845 = vrot.lane.b32.xlu1 %v840_v61, %s2176_s11  ;;  %1786 = vmatprep.mubr.msk.f32.mxu1 %vm48_vm0, %v34_v39 }
 0xae8   :  { %843 = vrot.lane.b32.xlu0 %v839_v63, %s2176_s11  ;;  %1787 = vmatmul.mubr.msk.f32.gmra.mrb[10].mxu1 %vm48_vm0, %v35_v40 }
 0xb59   :  { %v846_v2 = vpop.permute.xlu1 %845 }
 0xb5a   :  { %851 = vst.msk [vmem:[#allocation3 + $0x38] sm:$0xff] %vm264_vm1, %v846_v2  ;;  %v844_v4 = vpop.permute.xlu0 %843 }
 0xb5b   :  { %850 = vst.msk [vmem:[#allocation3 + $0x30] sm:$0xff] %vm264_vm1, %v844_v4  ;;  %1847 = vmatprep.mubr.msk.f32.mxu0 %vm264_vm1, %v844_v4 }
 0xb5c   :  { %1848 = vmatmul.mubr.msk.f32.vlgmr.msra.gmra.mrb[8].mxu0 %vm264_vm1, %v846_v2 }
 0xb5d   :  { %1961 = vmatpush3.bf16.msra.mxu0 %v2225_v3 }
 0xb5e   :  { %1963 = vmatprep.subr.bf16.mxu0 %v2238_v8 }
 0xb61   :  { %v1456_v5 = vld [vmem:[#allocation3 + $0x38] sm:$0xff]  ;;  %1965 = vmatpush3.bf16.msra.mxu0 %v2238_v8 }
 0xb62   :  { %v1455_v6 = vld [vmem:[#allocation3 + $0x30] sm:$0xff]  ;;  %1967 = vmatprep.subr.bf16.mxu0 %v2225_v3 }
 0xb63   :  { %v1995_v9 = vpack.c.bf16 %v1456_v5, %v1455_v6 }
 0xb65   :  { %1997 = vmatpush3.bf16.xpose.msk.msra.mxu1 %vm2294_vm2, %v1995_v9 }
 0xb66   :  { %1998 = vmatprep.subr.bf16.mxu1 %v2177_v45 }
 0xbbb   :  { %v1788_v48 = vpop.f32.mrb[10].mxu1 }
 0xbbc   :  { %v213_v49 = vpop.f32.mrb[11].mxu1  ;;  %v219_v56 = vadd.f32 %v1788_v48, %v2257_v12 }
 0xbbd   :  { %v214_v57 = vadd.f32 %v2257_v12, %v213_v49 }
 0xc2f   :  { %v1849_v13 = vpop.f32.mrb[8].mxu0 }
 0xc30   :  { %v939_v14 = vadd.f32 %v1849_v13, %v209_v10  ;;  %v929_v15 = vpop.f32.mrb[9].mxu0 }
 0xc31   :  { %v938_v16 = vadd.f32 %v929_v15, %v204_v11 }
 0xc32   :  { %v1649_v17 = vmul.f32 -1.442695, %v939_v14 }
 0xc33   :  { %v1648_v18 = vmul.f32 -1.442695, %v938_v16 }
 0xc34   :  { %2102 = vpow2.f32 %v1649_v17 }
 0xc35   :  { %2104 = vpow2.f32 %v1648_v18 }
 0xc3e   :  { %v2103_v19 = vpop.eup %2102 }
 0xc3f   :  { %v2105_v20 = vpop.eup %2104  ;;  %v947_v21 = vadd.f32 1.0, %v2103_v19 }
 0xc40   :  { %v946_v22 = vadd.f32 1.0, %v2105_v20 }
 0xc41   :  { %2106 = vrcp.f32 %v947_v21 }
 0xc42   :  { %2108 = vrcp.f32 %v946_v22 }
 0xc4b   :  { %v2107_v23 = vpop.eup %2106 }
 0xc4c   :  { %v2109_v24 = vpop.eup %2108  ;;  %v953_v25 = vmul.f32 2.0, %v2107_v23  ;;  %v957_v33 = vmul.f32 %v2107_v23, %v2383_v52 }
 0xc4d   :  { %v952_v26 = vmul.f32 2.0, %v2109_v24  ;;  %v956_v35 = vmul.f32 %v2109_v24, %v2385_v55 }
 0xc4e   :  { %v1651_v27 = vadd.f32 -1.0, %v953_v25  ;;  %v37_v25 = vld [vmem:[%s2546_s0 + $0x68] sm:$0xff] }
 0xc4f   :  { %v1650_v28 = vadd.f32 -1.0, %v952_v26 }
 0xc50   :  { %962 = vrot.lane.b32.xlu1 %v1651_v27, %s2175_s3 }
 0xc51   :  { %960 = vrot.lane.b32.xlu0 %v1650_v28, %s2175_s3 }
 0xcc2   :  { %v963_v29 = vpop.permute.xlu1 %962 }
 0xcc3   :  { %v967_v30 = vmul.f32 %v2107_v23, %v963_v29  ;;  %v961_v31 = vpop.permute.xlu0 %960 }
 0xcc4   :  { %v966_v32 = vmul.f32 %v2109_v24, %v961_v31 }
 0xcc5   :  { %972 = vrot.lane.b32.xlu1 %v967_v30, %s2176_s11 }
 0xcc6   :  { %970 = vrot.lane.b32.xlu0 %v966_v32, %s2176_s11 }
 0xd37   :  { %v973_v34 = vpop.permute.xlu1 %972 }
 0xd38   :  { %v2420_v36 = vadd.f32 %v973_v34, %v957_v33  ;;  %v971_v37 = vpop.permute.xlu0 %970 }
 0xd39   :  { %v2422_v38 = vadd.f32 %v971_v37, %v956_v35 }
 0xd3a   :  { %2110 = vtanh.f32 %v2420_v36 }
 0xd3b   :  { %2112 = vtanh.f32 %v2422_v38 }
 0xd44   :  { %v2111_v41 = vpop.eup %2110 }
 0xd45   :  { %v2113_v42 = vpop.eup %2112  ;;  %984 = vrot.lane.b32.xlu1 %v2111_v41, %s2175_s3 }
 0xd46   :  { %982 = vrot.lane.b32.xlu0 %v2113_v42, %s2175_s3 }
 0xdb7   :  { %v985_v43 = vpop.permute.xlu1 %984 }
 0xdb8   :  { %v989_v44 = vmul.f32 %v2107_v23, %v985_v43  ;;  %v983_v46 = vpop.permute.xlu0 %982 }
 0xdb9   :  { %v988_v47 = vmul.f32 %v2109_v24, %v983_v46  ;;  %v36_v24 = vld [vmem:[%s2546_s0 + $0x60] sm:$0xff] }
 0xdba   :  { %994 = vrot.lane.b32.xlu1 %v989_v44, %s2176_s11  ;;  %1789 = vmatprep.mubr.msk.f32.mxu1 %vm48_vm0, %v36_v24 }
 0xdbb   :  { %992 = vrot.lane.b32.xlu0 %v988_v47, %s2176_s11  ;;  %1790 = vmatmul.mubr.msk.f32.gmra.mrb[12].mxu1 %vm48_vm0, %v37_v25 }
 0xe2c   :  { %v995_v50 = vpop.permute.xlu1 %994 }
 0xe2d   :  { %1000 = vst.msk [vmem:[#allocation3 + $0x48] sm:$0xff] %vm264_vm1, %v995_v50  ;;  %v993_v51 = vpop.permute.xlu0 %992 }
 0xe2e   :  { %999 = vst.msk [vmem:[#allocation3 + $0x40] sm:$0xff] %vm264_vm1, %v993_v51  ;;  %1858 = vmatprep.mubr.msk.f32.mxu0 %vm264_vm1, %v993_v51 }
 0xe2f   :  { %1859 = vmatmul.mubr.msk.f32.vlgmr.msra.gmra.mrb[10].mxu0 %vm264_vm1, %v995_v50 }
 0xe30   :  { %1969 = vmatpush3.bf16.msra.mxu0 %v2225_v3 }
 0xe31   :  { %1971 = vmatprep.subr.bf16.mxu0 %v2238_v8 }
 0xe34   :  { %v1458_v52 = vld [vmem:[#allocation3 + $0x48] sm:$0xff]  ;;  %1973 = vmatpush3.bf16.msra.mxu0 %v2238_v8 }
 0xe35   :  { %v1457_v53 = vld [vmem:[#allocation3 + $0x40] sm:$0xff]  ;;  %1975 = vmatprep.subr.bf16.mxu0 %v2225_v3 }
 0xe36   :  { %v1999_v55 = vpack.c.bf16 %v1458_v52, %v1457_v53 }
 0xe38   :  { %2001 = vmatpush3.bf16.xpose.msk.msra.mxu1 %vm2294_vm2, %v1999_v55 }
 0xe39   :  { %2002 = vmatprep.subr.bf16.mxu1 %v2177_v45 }
 0xe8e   :  { %v1791_v32 = vpop.f32.mrb[12].mxu1 }
 0xe8f   :  { %v223_v33 = vpop.f32.mrb[13].mxu1  ;;  %v229_v39 = vadd.f32 %v1791_v32, %v2257_v12 }
 0xe90   :  { %v224_v40 = vadd.f32 %v2257_v12, %v223_v33 }
 0xf02   :  { %v1860_v58 = vpop.f32.mrb[10].mxu0 }
 0xf03   :  { %v1088_v59 = vadd.f32 %v1860_v58, %v219_v56  ;;  %v1078_v60 = vpop.f32.mrb[11].mxu0 }
 0xf04   :  { %v1087_v61 = vadd.f32 %v1078_v60, %v214_v57 }
 0xf05   :  { %v1655_v62 = vmul.f32 -1.442695, %v1088_v59 }
 0xf06   :  { %v1654_v63 = vmul.f32 -1.442695, %v1087_v61 }
 0xf07   :  { %2114 = vpow2.f32 %v1655_v62 }
 0xf08   :  { %2116 = vpow2.f32 %v1654_v63 }
 0xf11   :  { %v2115_v0 = vpop.eup %2114 }
 0xf12   :  { %v2117_v1 = vpop.eup %2116  ;;  %v1096_v2 = vadd.f32 1.0, %v2115_v0 }
 0xf13   :  { %v1095_v4 = vadd.f32 1.0, %v2117_v1 }
 0xf14   :  { %2118 = vrcp.f32 %v1096_v2 }
 0xf15   :  { %2120 = vrcp.f32 %v1095_v4  ;;  %v38_v4 = vld [vmem:[%s2546_s0 + $0x70] sm:$0xff] }
 0xf16   :  { %1792 = vmatprep.mubr.msk.f32.mxu1 %vm48_vm0, %v38_v4 }
 0xf1e   :  { %v2119_v5 = vpop.eup %2118 }
 0xf1f   :  { %v2121_v6 = vpop.eup %2120  ;;  %v1102_v9 = vmul.f32 2.0, %v2119_v5  ;;  %v1106_v18 = vmul.f32 %v2119_v5, %v2420_v36 }
 0xf20   :  { %v1101_v10 = vmul.f32 2.0, %v2121_v6  ;;  %v1105_v20 = vmul.f32 %v2121_v6, %v2422_v38 }
 0xf21   :  { %v1657_v11 = vadd.f32 -1.0, %v1102_v9 }
 0xf22   :  { %v1656_v13 = vadd.f32 -1.0, %v1101_v10 }
 0xf23   :  { %1111 = vrot.lane.b32.xlu1 %v1657_v11, %s2175_s3 }
 0xf24   :  { %1109 = vrot.lane.b32.xlu0 %v1656_v13, %s2175_s3 }
 0xf95   :  { %v1112_v14 = vpop.permute.xlu1 %1111 }
 0xf96   :  { %v1116_v15 = vmul.f32 %v2119_v5, %v1112_v14  ;;  %v1110_v16 = vpop.permute.xlu0 %1109 }
 0xf97   :  { %v1115_v17 = vmul.f32 %v2121_v6, %v1110_v16 }
 0xf98   :  { %1121 = vrot.lane.b32.xlu1 %v1116_v15, %s2176_s11 }
 0xf99   :  { %1119 = vrot.lane.b32.xlu0 %v1115_v17, %s2176_s11 }
0x100a   :  { %v1122_v19 = vpop.permute.xlu1 %1121 }
0x100b   :  { %v2457_v21 = vadd.f32 %v1122_v19, %v1106_v18  ;;  %v1120_v22 = vpop.permute.xlu0 %1119 }
0x100c   :  { %v2459_v23 = vadd.f32 %v1120_v22, %v1105_v20 }
0x100d   :  { %2122 = vtanh.f32 %v2457_v21 }
0x100e   :  { %2124 = vtanh.f32 %v2459_v23 }
0x1017   :  { %v2123_v26 = vpop.eup %2122 }
0x1018   :  { %v2125_v27 = vpop.eup %2124  ;;  %1133 = vrot.lane.b32.xlu1 %v2123_v26, %s2175_s3 }
0x1019   :  { %1131 = vrot.lane.b32.xlu0 %v2125_v27, %s2175_s3 }
0x108a   :  { %v1134_v28 = vpop.permute.xlu1 %1133 }
0x108b   :  { %v1138_v29 = vmul.f32 %v2119_v5, %v1134_v28  ;;  %v1132_v30 = vpop.permute.xlu0 %1131  ;;  %v39_v5 = vld [vmem:[%s2546_s0 + $0x78] sm:$0xff] }
0x108c   :  { %v1137_v31 = vmul.f32 %v2121_v6, %v1132_v30  ;;  %1793 = vmatmul.mubr.msk.f32.gmra.mrb[14].mxu1 %vm48_vm0, %v39_v5 }
0x108d   :  { %1143 = vrot.lane.b32.xlu1 %v1138_v29, %s2176_s11  ;;  %1915 = vmatprep.mubr.msk.f32.mxu1 %vm2178_vm3, %v2174_v7 }
0x108e   :  { %1141 = vrot.lane.b32.xlu0 %v1137_v31, %s2176_s11 }
0x10ff   :  { %v1144_v34 = vpop.permute.xlu1 %1143 }
0x1100   :  { %1149 = vst.msk [vmem:[#allocation3 + $0x58] sm:$0xff] %vm264_vm1, %v1144_v34  ;;  %v1142_v35 = vpop.permute.xlu0 %1141 }
0x1101   :  { %1148 = vst.msk [vmem:[#allocation3 + $0x50] sm:$0xff] %vm264_vm1, %v1142_v35  ;;  %1869 = vmatprep.mubr.msk.f32.mxu0 %vm264_vm1, %v1142_v35 }
0x1102   :  { %1870 = vmatmul.mubr.msk.f32.vlgmr.msra.gmra.mrb[12].mxu0 %vm264_vm1, %v1144_v34 }
0x1103   :  { %1977 = vmatpush3.bf16.msra.mxu0 %v2225_v3 }
0x1104   :  { %1979 = vmatprep.subr.bf16.mxu0 %v2238_v8 }
0x1107   :  { %v1460_v36 = vld [vmem:[#allocation3 + $0x58] sm:$0xff]  ;;  %1981 = vmatpush3.bf16.msra.mxu0 %v2238_v8 }
0x1108   :  { %v1459_v37 = vld [vmem:[#allocation3 + $0x50] sm:$0xff] }
0x1109   :  { %v2003_v38 = vpack.c.bf16 %v1460_v36, %v1459_v37 }
0x110b   :  { %2005 = vmatpush3.bf16.xpose.msk.msra.mxu1 %vm2294_vm2, %v2003_v38 }
0x110c   :  { %2006 = vmatprep.subr.bf16.mxu1 %v2177_v45 }
0x115f   :  { %v1794_v15 = vpop.f32.mrb[14].mxu1 }
0x1160   :  { %v233_v16 = vpop.f32.mrb[15].mxu1  ;;  %v239_v22 = vadd.f32 %v1794_v15, %v2257_v12 }
0x11d5   :  { %v1871_v41 = vpop.f32.mrb[12].mxu0 }
0x11d6   :  { %v1237_v42 = vadd.f32 %v1871_v41, %v229_v39  ;;  %v1227_v43 = vpop.f32.mrb[13].mxu0 }
0x11d7   :  { %v1236_v3 = vadd.f32 %v1227_v43, %v224_v40 }
0x11d8   :  { %v1661_v44 = vmul.f32 -1.442695, %v1237_v42 }
0x11d9   :  { %v1660_v46 = vmul.f32 -1.442695, %v1236_v3 }
0x11da   :  { %2126 = vpow2.f32 %v1661_v44 }
0x11db   :  { %2128 = vpow2.f32 %v1660_v46 }
0x11e4   :  { %v2127_v8 = vpop.eup %2126 }
0x11e5   :  { %v2129_v47 = vpop.eup %2128  ;;  %v1245_v48 = vadd.f32 1.0, %v2127_v8 }
0x11e6   :  { %v1244_v49 = vadd.f32 1.0, %v2129_v47 }
0x11e7   :  { %2130 = vrcp.f32 %v1245_v48 }
0x11e8   :  { %2132 = vrcp.f32 %v1244_v49 }
0x11f1   :  { %v2131_v50 = vpop.eup %2130 }
0x11f2   :  { %v2133_v51 = vpop.eup %2132  ;;  %v1251_v52 = vmul.f32 2.0, %v2131_v50  ;;  %v1255_v61 = vmul.f32 %v2131_v50, %v2457_v21 }
0x11f3   :  { %v1250_v53 = vmul.f32 2.0, %v2133_v51  ;;  %v1254_v63 = vmul.f32 %v2133_v51, %v2459_v23  ;;  %v234_v23 = vadd.f32 %v2257_v12, %v233_v16 }
0x11f4   :  { %v1663_v55 = vadd.f32 -1.0, %v1251_v52 }
0x11f5   :  { %v1662_v56 = vadd.f32 -1.0, %v1250_v53  ;;  %v1465_v53 = vld [vmem:[%s2551_s5] sm:$0xf]  ;;  %s2180_s5 = smov [#allocation4]  }
0x11f6   :  { %1260 = vrot.lane.b32.xlu1 %v1663_v55, %s2175_s3  ;;  %v2179_v55 = vmov 0   ;;  %s1599_s16 = sshll.u32 %s2180_s5, 4  ;;  %s1600_s16 = int_to_ptr.vmem [resolvable:$true] %s1599_s16 }
0x11f7   :  { %1258 = vrot.lane.b32.xlu0 %v1662_v56, %s2175_s3  ;;  %s2150_s17 = scalar_lea.vmem %s1600_s16, 64  ;;  %p2155_p1 = scmp.lt.s32.totalorder %s1600_s16, %s1600_s16 }
0x11f8   :  { %2053 = vset.pattern.permute.xlu0 %v2179_v55  ;;  %p2151_p0 = scmp.ne.s32.totalorder %s1600_s16, %s2150_s17  ;;  %p2156_p2 = scmp.lt.s32.totalorder %s2150_s17, %s2150_s17 }
0x11fa   :  { %p2157_p3 = por %p2156_p2, %p2155_p1 }
0x11fc   :  { %p2158_p4 = pnand %p2157_p3, %p2151_p0 }
0x1268   :  { %v1261_v57 = vpop.permute.xlu1 %1260 }
0x1269   :  { %v1265_v58 = vmul.f32 %v2131_v50, %v1261_v57  ;;  %v1259_v59 = vpop.permute.xlu0 %1258 }
0x126a   :  { %v1264_v60 = vmul.f32 %v2133_v51, %v1259_v59 }
0x126b   :  { %1270 = vrot.lane.b32.xlu1 %v1265_v58, %s2176_s11 }
0x126c   :  { %1268 = vrot.lane.b32.xlu0 %v1264_v60, %s2176_s11  ;;  %v1448_v60 = vld [vmem:[%s2550_s4] sm:$0xf] }
0x12dd   :  { %v1271_v62 = vpop.permute.xlu1 %1270 }
0x12de   :  { %v1275_v0 = vadd.f32 %v1271_v62, %v1255_v61  ;;  %v1269_v1 = vpop.permute.xlu0 %1268 }
0x12df   :  { %v1274_v2 = vadd.f32 %v1269_v1, %v1254_v63 }
0x12e0   :  { %2134 = vtanh.f32 %v1275_v0 }
0x12e1   :  { %2136 = vtanh.f32 %v1274_v2 }
0x12ea   :  { %v2135_v6 = vpop.eup %2134 }
0x12eb   :  { %v2137_v9 = vpop.eup %2136  ;;  %1282 = vrot.lane.b32.xlu1 %v2135_v6, %s2175_s3 }
0x12ec   :  { %1280 = vrot.lane.b32.xlu0 %v2137_v9, %s2175_s3 }
0x135d   :  { %v1283_v10 = vpop.permute.xlu1 %1282 }
0x135e   :  { %v1287_v11 = vmul.f32 %v2131_v50, %v1283_v10  ;;  %v1281_v13 = vpop.permute.xlu0 %1280 }
0x135f   :  { %v1286_v14 = vmul.f32 %v2133_v51, %v1281_v13 }
0x1360   :  { %1292 = vrot.lane.b32.xlu1 %v1287_v11, %s2176_s11 }
0x1361   :  { %1290 = vrot.lane.b32.xlu0 %v1286_v14, %s2176_s11 }
0x13d2   :  { %v1293_v17 = vpop.permute.xlu1 %1292 }
0x13d3   :  { %1298 = vst.msk [vmem:[#allocation3 + $0x68] sm:$0xff] %vm264_vm1, %v1293_v17  ;;  %v1291_v18 = vpop.permute.xlu0 %1290 }
0x13d4   :  { %1297 = vst.msk [vmem:[#allocation3 + $0x60] sm:$0xff] %vm264_vm1, %v1291_v18  ;;  %1880 = vmatprep.mubr.msk.f32.mxu0 %vm264_vm1, %v1291_v18 }
0x13d5   :  { %1881 = vmatmul.mubr.msk.f32.vlgmr.msra.gmra.mrb[14].mxu0 %vm264_vm1, %v1293_v17 }
0x13da   :  { %v1462_v19 = vld [vmem:[#allocation3 + $0x68] sm:$0xff] }
0x13db   :  { %v1461_v20 = vld [vmem:[#allocation3 + $0x60] sm:$0xff] }
0x13dc   :  { %v2007_v21 = vpack.c.bf16 %v1462_v19, %v1461_v20 }
0x13de   :  { %2009 = vmatpush3.bf16.xpose.msk.msra.mxu1 %vm2294_vm2, %v2007_v21 }
0x13df   :  { %2010 = vmatprep.subr.bf16.mxu1 %v2177_v45 }
0x14a8   :  { %v1882_v24 = vpop.f32.mrb[14].mxu0 }
0x14a9   :  { %v1386_v25 = vadd.f32 %v1882_v24, %v239_v22  ;;  %v1376_v26 = vpop.f32.mrb[15].mxu0 }
0x14aa   :  { %v1385_v27 = vadd.f32 %v1376_v26, %v234_v23 }
0x14ab   :  { %v1667_v28 = vmul.f32 -1.442695, %v1386_v25 }
0x14ac   :  { %v1666_v29 = vmul.f32 -1.442695, %v1385_v27 }
0x14ad   :  { %2138 = vpow2.f32 %v1667_v28 }
0x14ae   :  { %2140 = vpow2.f32 %v1666_v29 }
0x14b7   :  { %v2139_v30 = vpop.eup %2138 }
0x14b8   :  { %v2141_v31 = vpop.eup %2140  ;;  %v1394_v32 = vadd.f32 1.0, %v2139_v30 }
0x14b9   :  { %v1393_v33 = vadd.f32 1.0, %v2141_v31 }
0x14ba   :  { %2142 = vrcp.f32 %v1394_v32 }
0x14bb   :  { %2144 = vrcp.f32 %v1393_v33 }
0x14c4   :  { %v2143_v34 = vpop.eup %2142 }
0x14c5   :  { %v2145_v45 = vpop.eup %2144  ;;  %v1400_v35 = vmul.f32 2.0, %v2143_v34  ;;  %v1404_v42 = vmul.f32 %v2143_v34, %v1275_v0 }
0x14c6   :  { %v1399_v36 = vmul.f32 2.0, %v2145_v45  ;;  %v1403_v3 = vmul.f32 %v2145_v45, %v1274_v2 }
0x14c7   :  { %v1669_v37 = vadd.f32 -1.0, %v1400_v35 }
0x14c8   :  { %v1668_v12 = vadd.f32 -1.0, %v1399_v36 }
0x14c9   :  { %1409 = vrot.lane.b32.xlu1 %v1669_v37, %s2175_s3 }
0x14ca   :  { %1407 = vrot.lane.b32.xlu0 %v1668_v12, %s2175_s3 }
0x153b   :  { %v1410_v38 = vpop.permute.xlu1 %1409 }
0x153c   :  { %v1414_v39 = vmul.f32 %v2143_v34, %v1410_v38  ;;  %v1408_v40 = vpop.permute.xlu0 %1407 }
0x153d   :  { %v1413_v41 = vmul.f32 %v2145_v45, %v1408_v40 }
0x153e   :  { %1419 = vrot.lane.b32.xlu1 %v1414_v39, %s2176_s11 }
0x153f   :  { %1417 = vrot.lane.b32.xlu0 %v1413_v41, %s2176_s11 }
0x15b0   :  { %v1420_v43 = vpop.permute.xlu1 %1419 }
0x15b1   :  { %v1424_v44 = vadd.f32 %v1420_v43, %v1404_v42  ;;  %v1418_v46 = vpop.permute.xlu0 %1417 }
0x15b2   :  { %v1423_v8 = vadd.f32 %v1418_v46, %v1403_v3 }
0x15b3   :  { %2146 = vtanh.f32 %v1424_v44 }
0x15b4   :  { %2148 = vtanh.f32 %v1423_v8 }
0x15bd   :  { %v2147_v47 = vpop.eup %2146 }
0x15be   :  { %v2149_v48 = vpop.eup %2148  ;;  %1431 = vrot.lane.b32.xlu1 %v2147_v47, %s2175_s3 }
0x15bf   :  { %1429 = vrot.lane.b32.xlu0 %v2149_v48, %s2175_s3 }
0x1630   :  { %v1432_v49 = vpop.permute.xlu1 %1431 }
0x1631   :  { %v1436_v50 = vmul.f32 %v2143_v34, %v1432_v49  ;;  %v1430_v51 = vpop.permute.xlu0 %1429 }
0x1632   :  { %v1435_v52 = vmul.f32 %v2145_v45, %v1430_v51 }
0x1633   :  { %1441 = vrot.lane.b32.xlu1 %v1436_v50, %s2176_s11 }
0x1634   :  { %1439 = vrot.lane.b32.xlu0 %v1435_v52, %s2176_s11 }
0x1638   :  { %1468 = vperm.xlu0 %2053, %v1465_v53  }
0x16a5   :  { %v1442_v56 = vpop.permute.xlu1 %1441 }
0x16a6   :  { %1447 = vst.msk [vmem:[#allocation3 + $0x78] sm:$0xff] %vm264_vm1, %v1442_v56  ;;  %v1440_v57 = vpop.permute.xlu0 %1439 }
0x16a7   :  { %1446 = vst.msk [vmem:[#allocation3 + $0x70] sm:$0xff] %vm264_vm1, %v1440_v57 }
0x16ad   :  { %v1464_v58 = vld [vmem:[#allocation3 + $0x78] sm:$0xff] }
0x16ae   :  { %v1463_v59 = vld [vmem:[#allocation3 + $0x70] sm:$0xff] }
0x16af   :  { %v2011_v7 = vpack.c.bf16 %v1464_v58, %v1463_v59 }
0x16b1   :  { %2013 = vmatpush3.bf16.xpose.msk.msra.mxu1 %vm2294_vm2, %v2011_v7 }
0x16b7   :  { %v1469_v61 = vpop.permute.xlu0 %1468 }
0x16b8   :  { %1916 = vmatmul.mubr.msk.f32.vlgmr.msra.gmra.mrb[16].mxu1 %vm264_vm1, %v1448_v60 }
0x178b   :  { %v1588_v62 = vpop.f32.mrb[16].mxu1 }
0x178c   :  { %v1589_v63 = vadd.f32 %v1588_v62, %v1469_v61  ;;  %v1917_v0 = vpop.f32.mrb[17].mxu1 }
0x178e   :  { %1592 = vst [vmem:[#allocation4] sm:$0xf] %v1589_v63 }
0x178f   :  { %2161 = shalt.err (!%p2158_p4)
}
0x1790   :  { %s2162_s4 = scalar_lea.hbm %s2552_s6, 64 }
0x1791   :  { %p2163_p5 = scmp.ne.s32.totalorder %s2552_s6, %s2162_s4  ;;  %p2166_p6 = scmp.lt.u32.totalorder %s2162_s4, %s2552_s6 }
0x1793   :  { %p2168_p7 = pnand %p2166_p6, %p2163_p5 }
0x1795   :  { %2171 = shalt.err (!%p2168_p7)
}
0x1796   :  { %1602 = dma.vmem_to_hbm [thread:$0]  %s1600_s16, 64, %s2552_s6, [#allocation5]  }
0x1797   :  { %2172 = dma.done.wait [#allocation5], 64  }
0x1798   :  { %2173 = vsyncadd [#allocation5], 4294967232 }
0x1799   :  { %1606 = vsyncpa [#allocation5], 1 }

</bundles_post_ra>
